<compile_context>
chip_gen: v7x
topology: tpu7x:2x2x1
jax: 0.10.0
libtpu: 0.0.40
codegen_flags: <defaults>
</compile_context>

<pallas_src>
import math
import jax
import jax.numpy as jnp
from jax import lax
from jax.experimental import pallas as pl
from jax.experimental.pallas import tpu as pltpu

# ---------------- model hyper-params (small, TPU-tile friendly) -------------
B = 2            # batch
S = 8            # sequence length
H = 128          # embedding_size (stand-in for 768)
NH = 4           # attention heads
HD = H // NH     # head dim
FF = 256         # FFN hidden
CLS_HID = 256    # classifier hidden (matches nn.Linear(E, 256))
NUM_LABELS = 2   # number_of_labels
LANE = 128       # lane-padded logits width (dense output store)
VOCAB = 64
LN_EPS = 1e-12


def _layer_norm(x, gamma, beta):
    mean = jnp.mean(x, axis=-1, keepdims=True)
    var = jnp.mean((x - mean) * (x - mean), axis=-1, keepdims=True)
    return (x - mean) * lax.rsqrt(var + LN_EPS) * gamma + beta


# ---------------------------------------------------------------------------
# Single fused Pallas kernel: embeddings -> encoder layer -> classifier slab.
# One grid step == one batch row; all weights are resident full blocks.
# ---------------------------------------------------------------------------
def fused_bert_kernel(ids_ref, mask_ref,
                      wemb_ref, pemb_ref,
                      wqkv_ref, bqkv_ref,
                      wo_ref, bo_ref, ln1g_ref, ln1b_ref,
                      w1_ref, b1_ref, w2_ref, b2_ref,
                      ln2g_ref, ln2b_ref,
                      cw_ref, cb_ref,
                      o_ref):
    b = pl.program_id(0)

    # ---- embedding lookup as one-hot @ word_emb ----
    # TODO(synk): at real HF vocab (~30k) switch to a scalar-prefetch row
    # gather (PrefetchScalarGridSpec); at VOCAB=64 the one-hot matmul rides
    # the otherwise-idle MXU.
    ids = ids_ref[...]                                              # (S, 1) int32
    iota = lax.broadcasted_iota(jnp.int32, (S, VOCAB), 1)
    onehot = (iota == ids).astype(jnp.bfloat16)                     # (S, VOCAB)
    x = jnp.dot(onehot, wemb_ref[...],
                preferred_element_type=jnp.float32)                 # (S, H) f32
    x = x + pemb_ref[...]                                           # + positional

    # ---- attention mask bias for this batch row (hoisted broadcast) ----
    mb = mask_ref[pl.ds(b, 1), :]                                   # (1, S) f32
    mask_bias = jnp.broadcast_to((mb - 1.0) * 1e9, (S, S))          # (S, S)

    # ---- fused QKV projection: one MXU pass with N = 3H ----
    xb = x.astype(jnp.bfloat16)
    qkv = jnp.dot(xb, wqkv_ref[...],
                  preferred_element_type=jnp.float32) + bqkv_ref[...]   # (S, 3H)
    # 128-aligned lane slices are free; bf16 casts hoisted out of head loop.
    q = qkv[:, 0:H].astype(jnp.bfloat16)                            # (S, H)
    v = qkv[:, 2 * H:3 * H].astype(jnp.bfloat16)                    # (S, H)
    kt = qkv[:, H:2 * H].T.astype(jnp.bfloat16)                     # (H, S), one XLU transpose

    # ---- per-head attention; head contexts folded straight into wo ----
    scale = 1.0 / math.sqrt(HD)
    attn = jnp.zeros((S, H), jnp.float32)
    for h in range(NH):                                             # static unrolled loop
        c0 = h * HD
        s = jnp.dot(q[:, c0:c0 + HD], kt[c0:c0 + HD, :],
                    preferred_element_type=jnp.float32)             # (S, S)
        s = s * scale + mask_bias
        s = s - jnp.max(s, axis=-1, keepdims=True)
        p = jnp.exp(s)
        p = p * pl.reciprocal(jnp.sum(p, axis=-1, keepdims=True), approx=True)
        ctx = jnp.dot(p.astype(jnp.bfloat16), v[:, c0:c0 + HD],
                      preferred_element_type=jnp.float32)           # (S, HD)
        # fold this head into the output projection (static sublane slice of wo)
        attn = attn + jnp.dot(ctx.astype(jnp.bfloat16), wo_ref[c0:c0 + HD, :],
                              preferred_element_type=jnp.float32)
    attn = attn + bo_ref[...]

    h1 = _layer_norm(x + attn, ln1g_ref[...], ln1b_ref[...])

    ff = jnp.dot(h1.astype(jnp.bfloat16), w1_ref[...],
                 preferred_element_type=jnp.float32) + b1_ref[...]
    ff = jax.nn.gelu(ff, approximate=True)  # TODO(synk): HF BERT uses exact erf GELU
    ff = jnp.dot(ff.astype(jnp.bfloat16), w2_ref[...],
                 preferred_element_type=jnp.float32) + b2_ref[...]
    out = _layer_norm(h1 + ff, ln2g_ref[...], ln2b_ref[...])        # (S, H)

    # ---- pre-composed classifier head on the whole slab (dense vst);
    #      the CLS row per batch is sliced out in the XLA wrapper. ----
    o_ref[...] = jnp.dot(out.astype(jnp.bfloat16), cw_ref[...],
                         preferred_element_type=jnp.float32) + cb_ref[...]


def fused_forward(ids, mask, p):
    ids_flat = ids.reshape(B * S, 1)
    maskf = mask.astype(jnp.float32)                                 # (B, S)
    weight_args = [p["word_emb"], p["pos_emb"],
                   p["wqkv"], p["bqkv"],
                   p["wo"], p["bo"], p["ln1_g"], p["ln1_b"],
                   p["w1"], p["b1"], p["w2"], p["b2"],
                   p["ln2_g"], p["ln2_b"],
                   p["cw"], p["cb"]]
    in_specs = ([pl.BlockSpec((S, 1), lambda b: (b, 0)),             # ids rows of this batch
                 pl.BlockSpec(maskf.shape, lambda b: (0, 0))]        # full mask, resident
                + [pl.BlockSpec(w.shape, lambda b: (0, 0))           # weights, resident
                   for w in weight_args])
    return pl.pallas_call(
        fused_bert_kernel,
        out_shape=jax.ShapeDtypeStruct((B * S, LANE), jnp.float32),
        grid=(B,),
        in_specs=in_specs,
        out_specs=pl.BlockSpec((S, LANE), lambda b: (b, 0)),
        compiler_params=pltpu.CompilerParams(dimension_semantics=("parallel",)),
    )(ids_flat, maskf, *weight_args)


# ---------------------------------------------------------------------------
# Parameter init (deterministic, synthetic).  Matmul weights stored in bf16,
# biases / LayerNorm params in f32.  QKV weights pre-concatenated to (H, 3H);
# classifier Linears pre-composed (no activation between them) into a single
# lane-padded (H, 128) matmul.
# ---------------------------------------------------------------------------
def init_params(key):
    ks = iter(jax.random.split(key, 20))

    def nrm(shape, std=0.02):
        return (std * jax.random.normal(next(ks), shape)).astype(jnp.float32)

    wq, wk, wv = nrm((H, H)), nrm((H, H)), nrm((H, H))
    wqkv = jnp.concatenate([wq, wk, wv], axis=1).astype(jnp.bfloat16)    # (H, 3H)
    bqkv = jnp.zeros((1, 3 * H), jnp.float32)

    # classifier: Linear(H, 256) -> Linear(256, num_labels), nn.Sequential of
    # two Linears with NO activation between them, so fold host-side:
    #   logits = (x @ cw1 + cb1) @ cw2 + cb2 = x @ (cw1 @ cw2) + (cb1 @ cw2 + cb2)
    cw1 = nrm((H, CLS_HID))
    cb1 = jnp.zeros((1, CLS_HID), jnp.float32)
    cw2 = nrm((CLS_HID, NUM_LABELS))
    cb2 = jnp.zeros((1, NUM_LABELS), jnp.float32)
    cw2_pad = jnp.zeros((CLS_HID, LANE), jnp.float32).at[:, :NUM_LABELS].set(cw2)
    cb2_pad = jnp.zeros((1, LANE), jnp.float32).at[:, :NUM_LABELS].set(cb2)
    cw = (cw1 @ cw2_pad).astype(jnp.bfloat16)                            # (H, LANE)
    cb = (cb1 @ cw2_pad + cb2_pad).astype(jnp.float32)                   # (1, LANE)

    p = {
        "word_emb": nrm((VOCAB, H)).astype(jnp.bfloat16),
        "pos_emb": nrm((S, H)),                                          # f32, per-batch block
        "wqkv": wqkv, "bqkv": bqkv,
        "wo": nrm((H, H)).astype(jnp.bfloat16), "bo": jnp.zeros((1, H), jnp.float32),
        "ln1_g": jnp.ones((1, H), jnp.float32), "ln1_b": jnp.zeros((1, H), jnp.float32),
        "w1": nrm((H, FF)).astype(jnp.bfloat16), "b1": jnp.zeros((1, FF), jnp.float32),
        "w2": nrm((FF, H)).astype(jnp.bfloat16), "b2": jnp.zeros((1, H), jnp.float32),
        "ln2_g": jnp.ones((1, H), jnp.float32), "ln2_b": jnp.zeros((1, H), jnp.float32),
        "cw": cw, "cb": cb,
    }
    return p


@jax.jit
def custom_bert_forward(ids, mask, params):
    # Single fused Pallas kernel: ids/mask -> per-token lane-padded logits;
    # the wrapper slices the CLS row of each batch and the first NUM_LABELS lanes.
    # TODO(synk): the real pretrained HF encoder stack has no in-script
    # equivalent; a single representative transformer layer is used instead.
    logits_pad = fused_forward(ids, mask, params)                    # (B*S, LANE)
    return logits_pad.reshape(B, S, LANE)[:, 0, :NUM_LABELS]         # (B, NUM_LABELS)


if __name__ == "__main__":
    key = jax.random.PRNGKey(0)
    pkey, ikey = jax.random.split(key)
    params = init_params(pkey)

    ids = jax.random.randint(ikey, (B, S), 0, VOCAB, dtype=jnp.int32)
    mask = jnp.ones((B, S), jnp.int32).at[1, S - 2:].set(0)          # pad last 2 of row 1

    logits = custom_bert_forward(ids, mask, params)
    jax.block_until_ready(logits)
    assert logits.shape == (B, NUM_LABELS) and logits.dtype == jnp.float32
    assert bool(jnp.all(jnp.isfinite(logits)))
    print("KERNEL_OK")
</pallas_src>

<mosaic_0001>
module attributes {stable_mosaic.version = 11 : i64} {
  func.func @fused_bert_kernel(%arg0: i32, %arg1: memref<8x1xi32, #tpu.memory_space<vmem>>, %arg2: memref<2x8xf32, #tpu.memory_space<vmem>>, %arg3: memref<64x128xbf16, #tpu.memory_space<vmem>>, %arg4: memref<8x128xf32, #tpu.memory_space<vmem>>, %arg5: memref<128x384xbf16, #tpu.memory_space<vmem>>, %arg6: memref<1x384xf32, #tpu.memory_space<vmem>>, %arg7: memref<128x128xbf16, #tpu.memory_space<vmem>>, %arg8: memref<1x128xf32, #tpu.memory_space<vmem>>, %arg9: memref<1x128xf32, #tpu.memory_space<vmem>>, %arg10: memref<1x128xf32, #tpu.memory_space<vmem>>, %arg11: memref<128x256xbf16, #tpu.memory_space<vmem>>, %arg12: memref<1x256xf32, #tpu.memory_space<vmem>>, %arg13: memref<256x128xbf16, #tpu.memory_space<vmem>>, %arg14: memref<1x128xf32, #tpu.memory_space<vmem>>, %arg15: memref<1x128xf32, #tpu.memory_space<vmem>>, %arg16: memref<1x128xf32, #tpu.memory_space<vmem>>, %arg17: memref<128x128xbf16, #tpu.memory_space<vmem>>, %arg18: memref<1x128xf32, #tpu.memory_space<vmem>>, %arg19: memref<8x128xf32, #tpu.memory_space<vmem>>) attributes {dimension_semantics = [#tpu.dimension_semantics<parallel>], iteration_bounds = array<i64: 2>, scalar_prefetch = 0 : i64, scratch_operands = 0 : i64, tpu.core_type = #tpu.core_type<tc>, window_params = [{transform_indices = @transform_0, window_bounds = array<i64: 8, 1>}, {pipeline_mode = #tpu.pipeline_mode<synchronous>, transform_indices = @transform_1, window_bounds = array<i64: 2, 8>}, {pipeline_mode = #tpu.pipeline_mode<synchronous>, transform_indices = @transform_2, window_bounds = array<i64: 64, 128>}, {pipeline_mode = #tpu.pipeline_mode<synchronous>, transform_indices = @transform_3, window_bounds = array<i64: 8, 128>}, {pipeline_mode = #tpu.pipeline_mode<synchronous>, transform_indices = @transform_4, window_bounds = array<i64: 128, 384>}, {pipeline_mode = #tpu.pipeline_mode<synchronous>, transform_indices = @transform_5, window_bounds = array<i64: 1, 384>}, {pipeline_mode = #tpu.pipeline_mode<synchronous>, transform_indices = @transform_6, window_bounds = array<i64: 128, 128>}, {pipeline_mode = #tpu.pipeline_mode<synchronous>, transform_indices = @transform_7, window_bounds = array<i64: 1, 128>}, {pipeline_mode = #tpu.pipeline_mode<synchronous>, transform_indices = @transform_8, window_bounds = array<i64: 1, 128>}, {pipeline_mode = #tpu.pipeline_mode<synchronous>, transform_indices = @transform_9, window_bounds = array<i64: 1, 128>}, {pipeline_mode = #tpu.pipeline_mode<synchronous>, transform_indices = @transform_10, window_bounds = array<i64: 128, 256>}, {pipeline_mode = #tpu.pipeline_mode<synchronous>, transform_indices = @transform_11, window_bounds = array<i64: 1, 256>}, {pipeline_mode = #tpu.pipeline_mode<synchronous>, transform_indices = @transform_12, window_bounds = array<i64: 256, 128>}, {pipeline_mode = #tpu.pipeline_mode<synchronous>, transform_indices = @transform_13, window_bounds = array<i64: 1, 128>}, {pipeline_mode = #tpu.pipeline_mode<synchronous>, transform_indices = @transform_14, window_bounds = array<i64: 1, 128>}, {pipeline_mode = #tpu.pipeline_mode<synchronous>, transform_indices = @transform_15, window_bounds = array<i64: 1, 128>}, {pipeline_mode = #tpu.pipeline_mode<synchronous>, transform_indices = @transform_16, window_bounds = array<i64: 128, 128>}, {pipeline_mode = #tpu.pipeline_mode<synchronous>, transform_indices = @transform_17, window_bounds = array<i64: 1, 128>}, {transform_indices = @transform_18, window_bounds = array<i64: 8, 128>}]} {
    %c0 = arith.constant 0 : index
    %c0_0 = arith.constant 0 : index
    %0 = vector.load %arg1[%c0, %c0_0] : memref<8x1xi32, #tpu.memory_space<vmem>>, vector<8x1xi32>
    %1 = tpu.iota {dimensions = array<i32: 1>} : vector<8x64xi32>
    %2 = vector.broadcast %0 : vector<8x1xi32> to vector<8x64xi32>
    %3 = arith.cmpi eq, %1, %2 : vector<8x64xi32>
    %4 = arith.extui %3 : vector<8x64xi1> to vector<8x64xi32>
    %5 = arith.sitofp %4 : vector<8x64xi32> to vector<8x64xf32>
    %6 = arith.truncf %5 : vector<8x64xf32> to vector<8x64xbf16>
    %c0_1 = arith.constant 0 : index
    %c0_2 = arith.constant 0 : index
    %7 = vector.load %arg3[%c0_1, %c0_2] : memref<64x128xbf16, #tpu.memory_space<vmem>>, vector<64x128xbf16>
    %cst = arith.constant dense<0.000000e+00> : vector<8x128xf32>
    %8 = tpu.matmul %6, %7, %cst {dimension_numbers = #tpu.dot_dimension_numbers<[1], [0], [0], [1], [0, 0, 1, 1], [], []>} : vector<8x64xbf16>, vector<64x128xbf16>, vector<8x128xf32> -> vector<8x128xf32>
    %c0_3 = arith.constant 0 : index
    %c0_4 = arith.constant 0 : index
    %9 = vector.load %arg4[%c0_3, %c0_4] : memref<8x128xf32, #tpu.memory_space<vmem>>, vector<8x128xf32>
    %10 = arith.addf %8, %9 : vector<8x128xf32>
    %11 = arith.index_cast %arg0 : i32 to index
    %c0_5 = arith.constant 0 : index
    %12 = vector.load %arg2[%11, %c0_5] : memref<2x8xf32, #tpu.memory_space<vmem>>, vector<1x8xf32>
    %cst_6 = arith.constant 1.000000e+00 : f32
    %13 = vector.broadcast %cst_6 : f32 to vector<1x8xf32>
    %14 = arith.subf %12, %13 : vector<1x8xf32>
    %cst_7 = arith.constant 1.000000e+09 : f32
    %15 = vector.broadcast %cst_7 : f32 to vector<1x8xf32>
    %16 = arith.mulf %14, %15 : vector<1x8xf32>
    %17 = vector.shape_cast %16 : vector<1x8xf32> to vector<1x8xf32>
    %18 = vector.broadcast %17 : vector<1x8xf32> to vector<8x8xf32>
    %19 = arith.truncf %10 : vector<8x128xf32> to vector<8x128xbf16>
    %c0_8 = arith.constant 0 : index
    %c0_9 = arith.constant 0 : index
    %20 = vector.load %arg5[%c0_8, %c0_9] : memref<128x384xbf16, #tpu.memory_space<vmem>>, vector<128x384xbf16>
    %cst_10 = arith.constant dense<0.000000e+00> : vector<8x384xf32>
    %21 = tpu.matmul %19, %20, %cst_10 {dimension_numbers = #tpu.dot_dimension_numbers<[1], [0], [0], [1], [0, 0, 1, 1], [], []>} : vector<8x128xbf16>, vector<128x384xbf16>, vector<8x384xf32> -> vector<8x384xf32>
    %c0_11 = arith.constant 0 : index
    %c0_12 = arith.constant 0 : index
    %22 = vector.load %arg6[%c0_11, %c0_12] : memref<1x384xf32, #tpu.memory_space<vmem>>, vector<1x384xf32>
    %23 = vector.broadcast %22 : vector<1x384xf32> to vector<8x384xf32>
    %24 = arith.addf %21, %23 : vector<8x384xf32>
    %25 = vector.extract_strided_slice %24 {offsets = [0, 0], sizes = [8, 128], strides = [1, 1]} : vector<8x384xf32> to vector<8x128xf32>
    %26 = arith.truncf %25 : vector<8x128xf32> to vector<8x128xbf16>
    %27 = vector.extract_strided_slice %24 {offsets = [0, 256], sizes = [8, 128], strides = [1, 1]} : vector<8x384xf32> to vector<8x128xf32>
    %28 = arith.truncf %27 : vector<8x128xf32> to vector<8x128xbf16>
    %29 = vector.extract_strided_slice %24 {offsets = [0, 128], sizes = [8, 128], strides = [1, 1]} : vector<8x384xf32> to vector<8x128xf32>
    %30 = tpu.transpose %29, [1, 0] : vector<8x128xf32> -> vector<128x8xf32>
    %31 = arith.truncf %30 : vector<128x8xf32> to vector<128x8xbf16>
    %cst_13 = arith.constant 0.000000e+00 : f32
    %32 = vector.broadcast %cst_13 : f32 to vector<8x128xf32>
    %33 = vector.extract_strided_slice %26 {offsets = [0, 0], sizes = [8, 32], strides = [1, 1]} : vector<8x128xbf16> to vector<8x32xbf16>
    %34 = vector.extract_strided_slice %31 {offsets = [0, 0], sizes = [32, 8], strides = [1, 1]} : vector<128x8xbf16> to vector<32x8xbf16>
    %cst_14 = arith.constant dense<0.000000e+00> : vector<8x8xf32>
    %35 = tpu.matmul %33, %34, %cst_14 {dimension_numbers = #tpu.dot_dimension_numbers<[1], [0], [0], [1], [0, 0, 1, 1], [], []>} : vector<8x32xbf16>, vector<32x8xbf16>, vector<8x8xf32> -> vector<8x8xf32>
    %cst_15 = arith.constant 0.176776692 : f32
    %36 = vector.broadcast %cst_15 : f32 to vector<8x8xf32>
    %37 = arith.mulf %35, %36 : vector<8x8xf32>
    %38 = arith.addf %37, %18 : vector<8x8xf32>
    %cst_16 = arith.constant dense<0xFF800000> : vector<8xf32>
    %39 = vector.multi_reduction <maximumf>, %38, %cst_16 [1] : vector<8x8xf32> to vector<8xf32>
    %40 = vector.shape_cast %39 : vector<8xf32> to vector<8x1xf32>
    %41 = vector.broadcast %40 : vector<8x1xf32> to vector<8x8xf32>
    %42 = arith.subf %38, %41 : vector<8x8xf32>
    %43 = math.exp %42 : vector<8x8xf32>
    %cst_17 = arith.constant dense<0.000000e+00> : vector<8xf32>
    %44 = vector.multi_reduction <add>, %43, %cst_17 [1] : vector<8x8xf32> to vector<8xf32>
    %45 = vector.shape_cast %44 : vector<8xf32> to vector<8x1xf32>
    %46 = tpu.reciprocal %45 {approx = true} : vector<8x1xf32> -> vector<8x1xf32>
    %47 = vector.broadcast %46 : vector<8x1xf32> to vector<8x8xf32>
    %48 = arith.mulf %43, %47 : vector<8x8xf32>
    %49 = arith.truncf %48 : vector<8x8xf32> to vector<8x8xbf16>
    %50 = vector.extract_strided_slice %28 {offsets = [0, 0], sizes = [8, 32], strides = [1, 1]} : vector<8x128xbf16> to vector<8x32xbf16>
    %cst_18 = arith.constant dense<0.000000e+00> : vector<8x32xf32>
    %51 = tpu.matmul %49, %50, %cst_18 {dimension_numbers = #tpu.dot_dimension_numbers<[1], [0], [0], [1], [0, 0, 1, 1], [], []>} : vector<8x8xbf16>, vector<8x32xbf16>, vector<8x32xf32> -> vector<8x32xf32>
    %52 = arith.truncf %51 : vector<8x32xf32> to vector<8x32xbf16>
    %c0_19 = arith.constant 0 : index
    %c0_20 = arith.constant 0 : index
    %53 = vector.load %arg7[%c0_19, %c0_20] : memref<128x128xbf16, #tpu.memory_space<vmem>>, vector<32x128xbf16>
    %cst_21 = arith.constant dense<0.000000e+00> : vector<8x128xf32>
    %54 = tpu.matmul %52, %53, %cst_21 {dimension_numbers = #tpu.dot_dimension_numbers<[1], [0], [0], [1], [0, 0, 1, 1], [], []>} : vector<8x32xbf16>, vector<32x128xbf16>, vector<8x128xf32> -> vector<8x128xf32>
    %55 = arith.addf %32, %54 : vector<8x128xf32>
    %56 = vector.extract_strided_slice %26 {offsets = [0, 32], sizes = [8, 32], strides = [1, 1]} : vector<8x128xbf16> to vector<8x32xbf16>
    %57 = vector.extract_strided_slice %31 {offsets = [32, 0], sizes = [32, 8], strides = [1, 1]} : vector<128x8xbf16> to vector<32x8xbf16>
    %cst_22 = arith.constant dense<0.000000e+00> : vector<8x8xf32>
    %58 = tpu.matmul %56, %57, %cst_22 {dimension_numbers = #tpu.dot_dimension_numbers<[1], [0], [0], [1], [0, 0, 1, 1], [], []>} : vector<8x32xbf16>, vector<32x8xbf16>, vector<8x8xf32> -> vector<8x8xf32>
    %cst_23 = arith.constant 0.176776692 : f32
    %59 = vector.broadcast %cst_23 : f32 to vector<8x8xf32>
    %60 = arith.mulf %58, %59 : vector<8x8xf32>
    %61 = arith.addf %60, %18 : vector<8x8xf32>
    %cst_24 = arith.constant dense<0xFF800000> : vector<8xf32>
    %62 = vector.multi_reduction <maximumf>, %61, %cst_24 [1] : vector<8x8xf32> to vector<8xf32>
    %63 = vector.shape_cast %62 : vector<8xf32> to vector<8x1xf32>
    %64 = vector.broadcast %63 : vector<8x1xf32> to vector<8x8xf32>
    %65 = arith.subf %61, %64 : vector<8x8xf32>
    %66 = math.exp %65 : vector<8x8xf32>
    %cst_25 = arith.constant dense<0.000000e+00> : vector<8xf32>
    %67 = vector.multi_reduction <add>, %66, %cst_25 [1] : vector<8x8xf32> to vector<8xf32>
    %68 = vector.shape_cast %67 : vector<8xf32> to vector<8x1xf32>
    %69 = tpu.reciprocal %68 {approx = true} : vector<8x1xf32> -> vector<8x1xf32>
    %70 = vector.broadcast %69 : vector<8x1xf32> to vector<8x8xf32>
    %71 = arith.mulf %66, %70 : vector<8x8xf32>
    %72 = arith.truncf %71 : vector<8x8xf32> to vector<8x8xbf16>
    %73 = vector.extract_strided_slice %28 {offsets = [0, 32], sizes = [8, 32], strides = [1, 1]} : vector<8x128xbf16> to vector<8x32xbf16>
    %cst_26 = arith.constant dense<0.000000e+00> : vector<8x32xf32>
    %74 = tpu.matmul %72, %73, %cst_26 {dimension_numbers = #tpu.dot_dimension_numbers<[1], [0], [0], [1], [0, 0, 1, 1], [], []>} : vector<8x8xbf16>, vector<8x32xbf16>, vector<8x32xf32> -> vector<8x32xf32>
    %75 = arith.truncf %74 : vector<8x32xf32> to vector<8x32xbf16>
    %c32 = arith.constant 32 : index
    %c0_27 = arith.constant 0 : index
    %76 = vector.load %arg7[%c32, %c0_27] : memref<128x128xbf16, #tpu.memory_space<vmem>>, vector<32x128xbf16>
    %cst_28 = arith.constant dense<0.000000e+00> : vector<8x128xf32>
    %77 = tpu.matmul %75, %76, %cst_28 {dimension_numbers = #tpu.dot_dimension_numbers<[1], [0], [0], [1], [0, 0, 1, 1], [], []>} : vector<8x32xbf16>, vector<32x128xbf16>, vector<8x128xf32> -> vector<8x128xf32>
    %78 = arith.addf %55, %77 : vector<8x128xf32>
    %79 = vector.extract_strided_slice %26 {offsets = [0, 64], sizes = [8, 32], strides = [1, 1]} : vector<8x128xbf16> to vector<8x32xbf16>
    %80 = vector.extract_strided_slice %31 {offsets = [64, 0], sizes = [32, 8], strides = [1, 1]} : vector<128x8xbf16> to vector<32x8xbf16>
    %cst_29 = arith.constant dense<0.000000e+00> : vector<8x8xf32>
    %81 = tpu.matmul %79, %80, %cst_29 {dimension_numbers = #tpu.dot_dimension_numbers<[1], [0], [0], [1], [0, 0, 1, 1], [], []>} : vector<8x32xbf16>, vector<32x8xbf16>, vector<8x8xf32> -> vector<8x8xf32>
    %cst_30 = arith.constant 0.176776692 : f32
    %82 = vector.broadcast %cst_30 : f32 to vector<8x8xf32>
    %83 = arith.mulf %81, %82 : vector<8x8xf32>
    %84 = arith.addf %83, %18 : vector<8x8xf32>
    %cst_31 = arith.constant dense<0xFF800000> : vector<8xf32>
    %85 = vector.multi_reduction <maximumf>, %84, %cst_31 [1] : vector<8x8xf32> to vector<8xf32>
    %86 = vector.shape_cast %85 : vector<8xf32> to vector<8x1xf32>
    %87 = vector.broadcast %86 : vector<8x1xf32> to vector<8x8xf32>
    %88 = arith.subf %84, %87 : vector<8x8xf32>
    %89 = math.exp %88 : vector<8x8xf32>
    %cst_32 = arith.constant dense<0.000000e+00> : vector<8xf32>
    %90 = vector.multi_reduction <add>, %89, %cst_32 [1] : vector<8x8xf32> to vector<8xf32>
    %91 = vector.shape_cast %90 : vector<8xf32> to vector<8x1xf32>
    %92 = tpu.reciprocal %91 {approx = true} : vector<8x1xf32> -> vector<8x1xf32>
    %93 = vector.broadcast %92 : vector<8x1xf32> to vector<8x8xf32>
    %94 = arith.mulf %89, %93 : vector<8x8xf32>
    %95 = arith.truncf %94 : vector<8x8xf32> to vector<8x8xbf16>
    %96 = vector.extract_strided_slice %28 {offsets = [0, 64], sizes = [8, 32], strides = [1, 1]} : vector<8x128xbf16> to vector<8x32xbf16>
    %cst_33 = arith.constant dense<0.000000e+00> : vector<8x32xf32>
    %97 = tpu.matmul %95, %96, %cst_33 {dimension_numbers = #tpu.dot_dimension_numbers<[1], [0], [0], [1], [0, 0, 1, 1], [], []>} : vector<8x8xbf16>, vector<8x32xbf16>, vector<8x32xf32> -> vector<8x32xf32>
    %98 = arith.truncf %97 : vector<8x32xf32> to vector<8x32xbf16>
    %c64 = arith.constant 64 : index
    %c0_34 = arith.constant 0 : index
    %99 = vector.load %arg7[%c64, %c0_34] : memref<128x128xbf16, #tpu.memory_space<vmem>>, vector<32x128xbf16>
    %cst_35 = arith.constant dense<0.000000e+00> : vector<8x128xf32>
    %100 = tpu.matmul %98, %99, %cst_35 {dimension_numbers = #tpu.dot_dimension_numbers<[1], [0], [0], [1], [0, 0, 1, 1], [], []>} : vector<8x32xbf16>, vector<32x128xbf16>, vector<8x128xf32> -> vector<8x128xf32>
    %101 = arith.addf %78, %100 : vector<8x128xf32>
    %102 = vector.extract_strided_slice %26 {offsets = [0, 96], sizes = [8, 32], strides = [1, 1]} : vector<8x128xbf16> to vector<8x32xbf16>
    %103 = vector.extract_strided_slice %31 {offsets = [96, 0], sizes = [32, 8], strides = [1, 1]} : vector<128x8xbf16> to vector<32x8xbf16>
    %cst_36 = arith.constant dense<0.000000e+00> : vector<8x8xf32>
    %104 = tpu.matmul %102, %103, %cst_36 {dimension_numbers = #tpu.dot_dimension_numbers<[1], [0], [0], [1], [0, 0, 1, 1], [], []>} : vector<8x32xbf16>, vector<32x8xbf16>, vector<8x8xf32> -> vector<8x8xf32>
    %cst_37 = arith.constant 0.176776692 : f32
    %105 = vector.broadcast %cst_37 : f32 to vector<8x8xf32>
    %106 = arith.mulf %104, %105 : vector<8x8xf32>
    %107 = arith.addf %106, %18 : vector<8x8xf32>
    %cst_38 = arith.constant dense<0xFF800000> : vector<8xf32>
    %108 = vector.multi_reduction <maximumf>, %107, %cst_38 [1] : vector<8x8xf32> to vector<8xf32>
    %109 = vector.shape_cast %108 : vector<8xf32> to vector<8x1xf32>
    %110 = vector.broadcast %109 : vector<8x1xf32> to vector<8x8xf32>
    %111 = arith.subf %107, %110 : vector<8x8xf32>
    %112 = math.exp %111 : vector<8x8xf32>
    %cst_39 = arith.constant dense<0.000000e+00> : vector<8xf32>
    %113 = vector.multi_reduction <add>, %112, %cst_39 [1] : vector<8x8xf32> to vector<8xf32>
    %114 = vector.shape_cast %113 : vector<8xf32> to vector<8x1xf32>
    %115 = tpu.reciprocal %114 {approx = true} : vector<8x1xf32> -> vector<8x1xf32>
    %116 = vector.broadcast %115 : vector<8x1xf32> to vector<8x8xf32>
    %117 = arith.mulf %112, %116 : vector<8x8xf32>
    %118 = arith.truncf %117 : vector<8x8xf32> to vector<8x8xbf16>
    %119 = vector.extract_strided_slice %28 {offsets = [0, 96], sizes = [8, 32], strides = [1, 1]} : vector<8x128xbf16> to vector<8x32xbf16>
    %cst_40 = arith.constant dense<0.000000e+00> : vector<8x32xf32>
    %120 = tpu.matmul %118, %119, %cst_40 {dimension_numbers = #tpu.dot_dimension_numbers<[1], [0], [0], [1], [0, 0, 1, 1], [], []>} : vector<8x8xbf16>, vector<8x32xbf16>, vector<8x32xf32> -> vector<8x32xf32>
    %121 = arith.truncf %120 : vector<8x32xf32> to vector<8x32xbf16>
    %c96 = arith.constant 96 : index
    %c0_41 = arith.constant 0 : index
    %122 = vector.load %arg7[%c96, %c0_41] : memref<128x128xbf16, #tpu.memory_space<vmem>>, vector<32x128xbf16>
    %cst_42 = arith.constant dense<0.000000e+00> : vector<8x128xf32>
    %123 = tpu.matmul %121, %122, %cst_42 {dimension_numbers = #tpu.dot_dimension_numbers<[1], [0], [0], [1], [0, 0, 1, 1], [], []>} : vector<8x32xbf16>, vector<32x128xbf16>, vector<8x128xf32> -> vector<8x128xf32>
    %124 = arith.addf %101, %123 : vector<8x128xf32>
    %c0_43 = arith.constant 0 : index
    %c0_44 = arith.constant 0 : index
    %125 = vector.load %arg8[%c0_43, %c0_44] : memref<1x128xf32, #tpu.memory_space<vmem>>, vector<1x128xf32>
    %126 = vector.broadcast %125 : vector<1x128xf32> to vector<8x128xf32>
    %127 = arith.addf %124, %126 : vector<8x128xf32>
    %128 = arith.addf %10, %127 : vector<8x128xf32>
    %c0_45 = arith.constant 0 : index
    %c0_46 = arith.constant 0 : index
    %129 = vector.load %arg9[%c0_45, %c0_46] : memref<1x128xf32, #tpu.memory_space<vmem>>, vector<1x128xf32>
    %c0_47 = arith.constant 0 : index
    %c0_48 = arith.constant 0 : index
    %130 = vector.load %arg10[%c0_47, %c0_48] : memref<1x128xf32, #tpu.memory_space<vmem>>, vector<1x128xf32>
    %cst_49 = arith.constant dense<0.000000e+00> : vector<8xf32>
    %131 = vector.multi_reduction <add>, %128, %cst_49 [1] : vector<8x128xf32> to vector<8xf32>
    %132 = vector.shape_cast %131 : vector<8xf32> to vector<8x1xf32>
    %cst_50 = arith.constant 1.280000e+02 : f32
    %133 = vector.broadcast %cst_50 : f32 to vector<8x1xf32>
    %134 = arith.divf %132, %133 : vector<8x1xf32>
    %135 = vector.broadcast %134 : vector<8x1xf32> to vector<8x128xf32>
    %136 = arith.subf %128, %135 : vector<8x128xf32>
    %137 = vector.broadcast %134 : vector<8x1xf32> to vector<8x128xf32>
    %138 = arith.subf %128, %137 : vector<8x128xf32>
    %139 = arith.mulf %136, %138 : vector<8x128xf32>
    %cst_51 = arith.constant dense<0.000000e+00> : vector<8xf32>
    %140 = vector.multi_reduction <add>, %139, %cst_51 [1] : vector<8x128xf32> to vector<8xf32>
    %141 = vector.shape_cast %140 : vector<8xf32> to vector<8x1xf32>
    %cst_52 = arith.constant 1.280000e+02 : f32
    %142 = vector.broadcast %cst_52 : f32 to vector<8x1xf32>
    %143 = arith.divf %141, %142 : vector<8x1xf32>
    %144 = vector.broadcast %134 : vector<8x1xf32> to vector<8x128xf32>
    %145 = arith.subf %128, %144 : vector<8x128xf32>
    %cst_53 = arith.constant 9.99999996E-13 : f32
    %146 = vector.broadcast %cst_53 : f32 to vector<8x1xf32>
    %147 = arith.addf %143, %146 : vector<8x1xf32>
    %148 = math.rsqrt %147 : vector<8x1xf32>
    %149 = vector.broadcast %148 : vector<8x1xf32> to vector<8x128xf32>
    %150 = arith.mulf %145, %149 : vector<8x128xf32>
    %151 = vector.broadcast %129 : vector<1x128xf32> to vector<8x128xf32>
    %152 = arith.mulf %150, %151 : vector<8x128xf32>
    %153 = vector.broadcast %130 : vector<1x128xf32> to vector<8x128xf32>
    %154 = arith.addf %152, %153 : vector<8x128xf32>
    %155 = arith.truncf %154 : vector<8x128xf32> to vector<8x128xbf16>
    %c0_54 = arith.constant 0 : index
    %c0_55 = arith.constant 0 : index
    %156 = vector.load %arg11[%c0_54, %c0_55] : memref<128x256xbf16, #tpu.memory_space<vmem>>, vector<128x256xbf16>
    %cst_56 = arith.constant dense<0.000000e+00> : vector<8x256xf32>
    %157 = tpu.matmul %155, %156, %cst_56 {dimension_numbers = #tpu.dot_dimension_numbers<[1], [0], [0], [1], [0, 0, 1, 1], [], []>} : vector<8x128xbf16>, vector<128x256xbf16>, vector<8x256xf32> -> vector<8x256xf32>
    %c0_57 = arith.constant 0 : index
    %c0_58 = arith.constant 0 : index
    %158 = vector.load %arg12[%c0_57, %c0_58] : memref<1x256xf32, #tpu.memory_space<vmem>>, vector<1x256xf32>
    %159 = vector.broadcast %158 : vector<1x256xf32> to vector<8x256xf32>
    %160 = arith.addf %157, %159 : vector<8x256xf32>
    %161 = arith.mulf %160, %160 : vector<8x256xf32>
    %162 = arith.mulf %160, %161 : vector<8x256xf32>
    %cst_59 = arith.constant 4.471500e-02 : f32
    %163 = vector.broadcast %cst_59 : f32 to vector<8x256xf32>
    %164 = arith.mulf %163, %162 : vector<8x256xf32>
    %165 = arith.addf %160, %164 : vector<8x256xf32>
    %cst_60 = arith.constant 0.797884583 : f32
    %166 = vector.broadcast %cst_60 : f32 to vector<8x256xf32>
    %167 = arith.mulf %166, %165 : vector<8x256xf32>
    %168 = math.tanh %167 : vector<8x256xf32>
    %cst_61 = arith.constant 1.000000e+00 : f32
    %169 = vector.broadcast %cst_61 : f32 to vector<8x256xf32>
    %170 = arith.addf %169, %168 : vector<8x256xf32>
    %cst_62 = arith.constant 5.000000e-01 : f32
    %171 = vector.broadcast %cst_62 : f32 to vector<8x256xf32>
    %172 = arith.mulf %171, %170 : vector<8x256xf32>
    %173 = arith.mulf %160, %172 : vector<8x256xf32>
    %174 = arith.truncf %173 : vector<8x256xf32> to vector<8x256xbf16>
    %c0_63 = arith.constant 0 : index
    %c0_64 = arith.constant 0 : index
    %175 = vector.load %arg13[%c0_63, %c0_64] : memref<256x128xbf16, #tpu.memory_space<vmem>>, vector<256x128xbf16>
    %cst_65 = arith.constant dense<0.000000e+00> : vector<8x128xf32>
    %176 = tpu.matmul %174, %175, %cst_65 {dimension_numbers = #tpu.dot_dimension_numbers<[1], [0], [0], [1], [0, 0, 1, 1], [], []>} : vector<8x256xbf16>, vector<256x128xbf16>, vector<8x128xf32> -> vector<8x128xf32>
    %c0_66 = arith.constant 0 : index
    %c0_67 = arith.constant 0 : index
    %177 = vector.load %arg14[%c0_66, %c0_67] : memref<1x128xf32, #tpu.memory_space<vmem>>, vector<1x128xf32>
    %178 = vector.broadcast %177 : vector<1x128xf32> to vector<8x128xf32>
    %179 = arith.addf %176, %178 : vector<8x128xf32>
    %180 = arith.addf %154, %179 : vector<8x128xf32>
    %c0_68 = arith.constant 0 : index
    %c0_69 = arith.constant 0 : index
    %181 = vector.load %arg15[%c0_68, %c0_69] : memref<1x128xf32, #tpu.memory_space<vmem>>, vector<1x128xf32>
    %c0_70 = arith.constant 0 : index
    %c0_71 = arith.constant 0 : index
    %182 = vector.load %arg16[%c0_70, %c0_71] : memref<1x128xf32, #tpu.memory_space<vmem>>, vector<1x128xf32>
    %cst_72 = arith.constant dense<0.000000e+00> : vector<8xf32>
    %183 = vector.multi_reduction <add>, %180, %cst_72 [1] : vector<8x128xf32> to vector<8xf32>
    %184 = vector.shape_cast %183 : vector<8xf32> to vector<8x1xf32>
    %cst_73 = arith.constant 1.280000e+02 : f32
    %185 = vector.broadcast %cst_73 : f32 to vector<8x1xf32>
    %186 = arith.divf %184, %185 : vector<8x1xf32>
    %187 = vector.broadcast %186 : vector<8x1xf32> to vector<8x128xf32>
    %188 = arith.subf %180, %187 : vector<8x128xf32>
    %189 = vector.broadcast %186 : vector<8x1xf32> to vector<8x128xf32>
    %190 = arith.subf %180, %189 : vector<8x128xf32>
    %191 = arith.mulf %188, %190 : vector<8x128xf32>
    %cst_74 = arith.constant dense<0.000000e+00> : vector<8xf32>
    %192 = vector.multi_reduction <add>, %191, %cst_74 [1] : vector<8x128xf32> to vector<8xf32>
    %193 = vector.shape_cast %192 : vector<8xf32> to vector<8x1xf32>
    %cst_75 = arith.constant 1.280000e+02 : f32
    %194 = vector.broadcast %cst_75 : f32 to vector<8x1xf32>
    %195 = arith.divf %193, %194 : vector<8x1xf32>
    %196 = vector.broadcast %186 : vector<8x1xf32> to vector<8x128xf32>
    %197 = arith.subf %180, %196 : vector<8x128xf32>
    %cst_76 = arith.constant 9.99999996E-13 : f32
    %198 = vector.broadcast %cst_76 : f32 to vector<8x1xf32>
    %199 = arith.addf %195, %198 : vector<8x1xf32>
    %200 = math.rsqrt %199 : vector<8x1xf32>
    %201 = vector.broadcast %200 : vector<8x1xf32> to vector<8x128xf32>
    %202 = arith.mulf %197, %201 : vector<8x128xf32>
    %203 = vector.broadcast %181 : vector<1x128xf32> to vector<8x128xf32>
    %204 = arith.mulf %202, %203 : vector<8x128xf32>
    %205 = vector.broadcast %182 : vector<1x128xf32> to vector<8x128xf32>
    %206 = arith.addf %204, %205 : vector<8x128xf32>
    %207 = arith.truncf %206 : vector<8x128xf32> to vector<8x128xbf16>
    %c0_77 = arith.constant 0 : index
    %c0_78 = arith.constant 0 : index
    %208 = vector.load %arg17[%c0_77, %c0_78] : memref<128x128xbf16, #tpu.memory_space<vmem>>, vector<128x128xbf16>
    %cst_79 = arith.constant dense<0.000000e+00> : vector<8x128xf32>
    %209 = tpu.matmul %207, %208, %cst_79 {dimension_numbers = #tpu.dot_dimension_numbers<[1], [0], [0], [1], [0, 0, 1, 1], [], []>} : vector<8x128xbf16>, vector<128x128xbf16>, vector<8x128xf32> -> vector<8x128xf32>
    %c0_80 = arith.constant 0 : index
    %c0_81 = arith.constant 0 : index
    %210 = vector.load %arg18[%c0_80, %c0_81] : memref<1x128xf32, #tpu.memory_space<vmem>>, vector<1x128xf32>
    %211 = vector.broadcast %210 : vector<1x128xf32> to vector<8x128xf32>
    %212 = arith.addf %209, %211 : vector<8x128xf32>
    %c0_82 = arith.constant 0 : index
    %c0_83 = arith.constant 0 : index
    %213 = vector.load %arg19[%c0_82, %c0_83] : memref<8x128xf32, #tpu.memory_space<vmem>>, vector<8x128xf32>
    tpu.vector_store %arg19[%c0_82, %c0_83], %212 {strides = array<i32>} : memref<8x128xf32, #tpu.memory_space<vmem>>, vector<8x128xf32>,
    return
  }
  func.func @transform_0(%arg0: i32) -> (i32, i32) {
    %c0_i32 = arith.constant 0 : i32
    %c0_i32_0 = arith.constant 0 : i32
    return %arg0, %c0_i32 : i32, i32
  }
  func.func @transform_1(%arg0: i32) -> (i32, i32) {
    %c0_i32 = arith.constant 0 : i32
    %c0_i32_0 = arith.constant 0 : i32
    %c0_i32_1 = arith.constant 0 : i32
    return %c0_i32, %c0_i32_0 : i32, i32
  }
  func.func @transform_2(%arg0: i32) -> (i32, i32) {
    %c0_i32 = arith.constant 0 : i32
    %c0_i32_0 = arith.constant 0 : i32
    %c0_i32_1 = arith.constant 0 : i32
    return %c0_i32, %c0_i32_0 : i32, i32
  }
  func.func @transform_3(%arg0: i32) -> (i32, i32) {
    %c0_i32 = arith.constant 0 : i32
    %c0_i32_0 = arith.constant 0 : i32
    %c0_i32_1 = arith.constant 0 : i32
    return %c0_i32, %c0_i32_0 : i32, i32
  }
  func.func @transform_4(%arg0: i32) -> (i32, i32) {
    %c0_i32 = arith.constant 0 : i32
    %c0_i32_0 = arith.constant 0 : i32
    %c0_i32_1 = arith.constant 0 : i32
    return %c0_i32, %c0_i32_0 : i32, i32
  }
  func.func @transform_5(%arg0: i32) -> (i32, i32) {
    %c0_i32 = arith.constant 0 : i32
    %c0_i32_0 = arith.constant 0 : i32
    %c0_i32_1 = arith.constant 0 : i32
    return %c0_i32, %c0_i32_0 : i32, i32
  }
  func.func @transform_6(%arg0: i32) -> (i32, i32) {
    %c0_i32 = arith.constant 0 : i32
    %c0_i32_0 = arith.constant 0 : i32
    %c0_i32_1 = arith.constant 0 : i32
    return %c0_i32, %c0_i32_0 : i32, i32
  }
  func.func @transform_7(%arg0: i32) -> (i32, i32) {
    %c0_i32 = arith.constant 0 : i32
    %c0_i32_0 = arith.constant 0 : i32
    %c0_i32_1 = arith.constant 0 : i32
    return %c0_i32, %c0_i32_0 : i32, i32
  }
  func.func @transform_8(%arg0: i32) -> (i32, i32) {
    %c0_i32 = arith.constant 0 : i32
    %c0_i32_0 = arith.constant 0 : i32
    %c0_i32_1 = arith.constant 0 : i32
    return %c0_i32, %c0_i32_0 : i32, i32
  }
  func.func @transform_9(%arg0: i32) -> (i32, i32) {
    %c0_i32 = arith.constant 0 : i32
    %c0_i32_0 = arith.constant 0 : i32
    %c0_i32_1 = arith.constant 0 : i32
    return %c0_i32, %c0_i32_0 : i32, i32
  }
  func.func @transform_10(%arg0: i32) -> (i32, i32) {
    %c0_i32 = arith.constant 0 : i32
    %c0_i32_0 = arith.constant 0 : i32
    %c0_i32_1 = arith.constant 0 : i32
    return %c0_i32, %c0_i32_0 : i32, i32
  }
  func.func @transform_11(%arg0: i32) -> (i32, i32) {
    %c0_i32 = arith.constant 0 : i32
    %c0_i32_0 = arith.constant 0 : i32
    %c0_i32_1 = arith.constant 0 : i32
    return %c0_i32, %c0_i32_0 : i32, i32
  }
  func.func @transform_12(%arg0: i32) -> (i32, i32) {
    %c0_i32 = arith.constant 0 : i32
    %c0_i32_0 = arith.constant 0 : i32
    %c0_i32_1 = arith.constant 0 : i32
    return %c0_i32, %c0_i32_0 : i32, i32
  }
  func.func @transform_13(%arg0: i32) -> (i32, i32) {
    %c0_i32 = arith.constant 0 : i32
    %c0_i32_0 = arith.constant 0 : i32
    %c0_i32_1 = arith.constant 0 : i32
    return %c0_i32, %c0_i32_0 : i32, i32
  }
  func.func @transform_14(%arg0: i32) -> (i32, i32) {
    %c0_i32 = arith.constant 0 : i32
    %c0_i32_0 = arith.constant 0 : i32
    %c0_i32_1 = arith.constant 0 : i32
    return %c0_i32, %c0_i32_0 : i32, i32
  }
  func.func @transform_15(%arg0: i32) -> (i32, i32) {
    %c0_i32 = arith.constant 0 : i32
    %c0_i32_0 = arith.constant 0 : i32
    %c0_i32_1 = arith.constant 0 : i32
    return %c0_i32, %c0_i32_0 : i32, i32
  }
  func.func @transform_16(%arg0: i32) -> (i32, i32) {
    %c0_i32 = arith.constant 0 : i32
    %c0_i32_0 = arith.constant 0 : i32
    %c0_i32_1 = arith.constant 0 : i32
    return %c0_i32, %c0_i32_0 : i32, i32
  }
  func.func @transform_17(%arg0: i32) -> (i32, i32) {
    %c0_i32 = arith.constant 0 : i32
    %c0_i32_0 = arith.constant 0 : i32
    %c0_i32_1 = arith.constant 0 : i32
    return %c0_i32, %c0_i32_0 : i32, i32
  }
  func.func @transform_18(%arg0: i32) -> (i32, i32) {
    %c0_i32 = arith.constant 0 : i32
    %c0_i32_0 = arith.constant 0 : i32
    return %arg0, %c0_i32 : i32, i32
  }
}

</mosaic_0001>

<bundles_post_ra>
// kernel: custom_bert_forward.1
= control target key start
LH: loop header
LB: loop body
LE: loop exit
PB: predicated region body
PF: predicated region fallthrough
CT: control target
= control target key end

     0   :  { %s4043_s0 = inlined_call_operand.vmem [shape: s32[16,1], index: 0, kind: input, shape index: {}]   ;;  %s4044_s1 = inlined_call_operand.vmem [shape: f32[2,8], index: 1, kind: input, shape index: {}]   ;;  %s4045_s2 = inlined_call_operand.hbm [shape: bf16[64,128], index: 2, kind: input, shape index: {}]   ;;  %s4046_s3 = inlined_call_operand.vmem [shape: f32[8,128], index: 3, kind: input, shape index: {}]   ;;  %s4047_s4 = inlined_call_operand.hbm [shape: bf16[128,384], index: 4, kind: input, shape index: {}]   ;;  %s4048_s5 = inlined_call_operand.vmem [shape: f32[1,384], index: 5, kind: input, shape index: {}]   ;;  %s4049_s6 = inlined_call_operand.vmem [shape: bf16[128,128], index: 6, kind: input, shape index: {}]   ;;  %s4050_s7 = inlined_call_operand.vmem [shape: f32[1,128], index: 7, kind: input, shape index: {}]   ;;  %s4051_s8 = inlined_call_operand.hbm [shape: f32[1,128], index: 8, kind: input, shape index: {}]   ;;  %s4052_s9 = inlined_call_operand.hbm [shape: f32[1,128], index: 9, kind: input, shape index: {}]   ;;  %s4053_s10 = inlined_call_operand.hbm [shape: bf16[128,256], index: 10, kind: input, shape index: {}]   ;;  %s4054_s11 = inlined_call_operand.vmem [shape: f32[1,256], index: 11, kind: input, shape index: {}]   ;;  %s4055_s12 = inlined_call_operand.hbm [shape: bf16[256,128], index: 12, kind: input, shape index: {}]   ;;  %s4056_s13 = inlined_call_operand.hbm [shape: f32[1,128], index: 13, kind: input, shape index: {}]   ;;  %s4057_s14 = inlined_call_operand.hbm [shape: f32[1,128], index: 14, kind: input, shape index: {}]   ;;  %s4058_s15 = inlined_call_operand.hbm [shape: f32[1,128], index: 15, kind: input, shape index: {}]   ;;  %s4059_s16 = inlined_call_operand.hbm [shape: bf16[128,128], index: 16, kind: input, shape index: {}]   ;;  %s4060_s17 = inlined_call_operand.hbm [shape: f32[1,128], index: 17, kind: input, shape index: {}]   ;;  %s4061_s18 = inlined_call_operand.vmem [shape: f32[16,128], index: 18, kind: output, shape index: {}]  }
   0x1   :  { %4069 = sst [smem:[#allocation26_spill]] %s4043_s0 }
   0x2   :  { %4070 = sst [smem:[#allocation27_spill]] %s4044_s1 }
   0x3   :  { %4071 = sst [smem:[#allocation28_spill]] %s4045_s2 }
   0x4   :  { %4072 = sst [smem:[#allocation29_spill]] %s4047_s4 }
   0x5   :  { %4073 = sst [smem:[#allocation30_spill]] %s4050_s7 }
   0x6   :  { %4074 = sst [smem:[#allocation31_spill]] %s4052_s9 }
   0x7   :  { %4075 = sst [smem:[#allocation32_spill]] %s4054_s11 }
   0x8   :  { %4076 = sst [smem:[#allocation33_spill]] %s4061_s18 }
   0x9   :  { %23 = vsyncpa [#allocation3], 0 }
   0xa   :  { %24 = vsyncpa [#allocation5], 0 }
   0xb   :  { %25 = vsyncpa [#allocation8], 0 }
   0xc   :  { %26 = vsyncpa [#allocation11], 0 }
   0xd   :  { %27 = vsyncpa [#allocation14], 0 }
   0xe   :  { %28 = vsyncpa [#allocation17], 0  ;;  %s3523_s27 = smov 0  }
   0xf LB: > { %4077 = sst [smem:[#allocation25_spill]] %s3403_s27  ;;  %s3405_s28 = smov [#allocation4]   ;;  %s3403_s27 = sphi %s3523_s27, %s34_s27  }
  0x10   : > { %s479_s29 = sshll.u32 %s3405_s28, 4  ;;  %s3529_s30 = sadd.s32 4294967295, %s3403_s27   ;;  %s3534_s29 = int_to_ptr.vmem [resolvable:$true] %s479_s29 }
  0x11   : > { %p2473_p0 = scmp.ge.s32.totalorder %s3403_s27, 1  ;;  %p448_p1 = scmp.lt.s32.totalorder %s3403_s27, 3 }
  0x12   : > { %p4064_p2 = scmp.eq.s32.totalorder %s3529_s30, 0  ;;  %s3406_s19 = smov [#allocation7]  }
  0x13   : > { %p3536_p3 = pnand %p2473_p0, %p448_p1  ;;  %s513_s1 = sshll.u32 %s3406_s19, 4  ;;  %s3542_s1 = int_to_ptr.vmem [resolvable:$true] %s513_s1 }
  0x14   : > { %s3407_s21 = smov [#allocation10]   ;;  %s4080_s4 = sld [smem:[#allocation29_spill]] }
  0x15   : > { %s4078_s0 = scalar_select %p3536_p3, 1, 0 }
  0x16   : > { %p2861_p4 = pneg %p3536_p3  ;;  %s3550_s22 = sshll.u32 %s3407_s21, 4  ;;  %s540_s22 = int_to_ptr.vmem [resolvable:$true] %s3550_s22 }
  0x18   : > { %p3546_p5 = pnand %p4064_p2, %p2861_p4 }
  0x1a   : > { %s3065_s24 = scalar_lea.hbm %s4080_s4, 3072  ;;  %p3560_p7 = pneg %p3546_p5 }
  0x1b   : > { %p3066_p6 = scmp.ne.s32.totalorder %s4080_s4, %s3065_s24  ;;  %p3072_p10 = scmp.lt.u32.totalorder %s3065_s24, %s4080_s4 }
  0x1d   : > { %p3068_p8 = pnand %p3560_p7, %p3066_p6 }
  0x1f   : > { %p3069_p9 = pneg %p3068_p8 }
  0x21   : > { %p3074_p11 = pnand %p3072_p10, %p3069_p9 }
  0x23   : > { %3077 = shalt.err (!%p3074_p11)
}
  0x24   : > { %s3078_s2 = scalar_lea.vmem %s3534_s29, 3072  ;;  %p3086_p1 = scmp.lt.s32.totalorder %s3534_s29, %s3534_s29 }
  0x25   : > { %p3079_p12 = scmp.ne.s32.totalorder %s3534_s29, %s3078_s2  ;;  %p3087_p4 = scmp.lt.s32.totalorder %s3078_s2, %s3078_s2 }
  0x27   : > { %p3081_p13 = pnand %p3079_p12, %p3560_p7  ;;  %p3088_p6 = por %p3087_p4, %p3086_p1 }
  0x29   : > { %p3082_p0 = pneg %p3081_p13 }
  0x2b   : > { %p3089_p8 = pnand %p3088_p6, %p3082_p0 }
  0x2d   : > { %3092 = shalt.err (!%p3089_p8)
}
  0x2e   : > { %s3408_s23 = smov 192   ;;  %s3409_s24 = smov 12  }
  0x2f   : > { %2867 = dma.hbm_to_vmem [thread:$0]  (!%p3546_p5), %s4080_s4, 3072, %s3534_s29, [#allocation5], %s3408_s23, %s3408_s23, %s3409_s24  }
  0x30   : > { %s4082_s9 = sld [smem:[#allocation31_spill]] }
  0x36   : > { %s3093_s27 = scalar_lea.hbm %s4082_s9, 16 }
  0x37   : > { %p3094_p9 = scmp.ne.s32.totalorder %s4082_s9, %s3093_s27  ;;  %p3100_p12 = scmp.lt.u32.totalorder %s3093_s27, %s4082_s9 }
  0x39   : > { %p3096_p10 = pnand %p3094_p9, %p3560_p7 }
  0x3b   : > { %p3097_p11 = pneg %p3096_p10 }
  0x3d   : > { %p3102_p13 = pnand %p3100_p12, %p3097_p11 }
  0x3f   : > { %3105 = shalt.err (!%p3102_p13)
}
  0x40   : > { %s3106_s29 = scalar_lea.vmem %s3542_s1, 16  ;;  %s3113_s11 = scalar_lea.vmem %s3542_s1, 32 }
  0x41   : > { %p3107_p0 = scmp.ne.s32.totalorder %s3542_s1, %s3106_s29  ;;  %p3114_p6 = scmp.lt.s32.totalorder %s3542_s1, %s3542_s1 }
  0x42   : > { %p3115_p8 = scmp.lt.s32.totalorder %s3113_s11, %s3106_s29 }
  0x43   : > { %p3109_p1 = pnand %p3107_p0, %p3560_p7 }
  0x44   : > { %p3116_p9 = por %p3115_p8, %p3114_p6 }
  0x45   : > { %p3110_p4 = pneg %p3109_p1 }
  0x47   : > { %p3117_p10 = pnand %p3116_p9, %p3110_p4 }
  0x49   : > { %3120 = shalt.err (!%p3117_p10)
}
  0x4a   : > { %2873 = dma.hbm_to_vmem [thread:$0]  (!%p3546_p5), %s4082_s9, 16, %s3542_s1, [#allocation8]  }
  0x4b   : > { %s3410_s27 = smov [#allocation13]   ;;  %s3121_s26 = scalar_lea.hbm %s4055_s12, 2048 }
  0x4c   : > { %s564_s23 = sshll.u32 %s3410_s27, 4  ;;  %p3122_p11 = scmp.ne.s32.totalorder %s4055_s12, %s3121_s26  ;;  %s565_s23 = int_to_ptr.vmem [resolvable:$true] %s564_s23 }
  0x4d   : > { %p3128_p0 = scmp.lt.u32.totalorder %s3121_s26, %s4055_s12 }
  0x4e   : > { %p3124_p12 = pnand %p3122_p11, %p3560_p7 }
  0x50   : > { %p3125_p13 = pneg %p3124_p12 }
  0x52   : > { %p3130_p1 = pnand %p3128_p0, %p3125_p13 }
  0x54   : > { %3133 = shalt.err (!%p3130_p1)
}
  0x55   : > { %s3134_s1 = scalar_lea.vmem %s540_s22, 2048  ;;  %p3142_p9 = scmp.lt.s32.totalorder %s540_s22, %s540_s22 }
  0x56   : > { %p3135_p4 = scmp.ne.s32.totalorder %s540_s22, %s3134_s1  ;;  %p3143_p10 = scmp.lt.s32.totalorder %s3134_s1, %s3134_s1 }
  0x58   : > { %p3137_p6 = pnand %p3135_p4, %p3560_p7  ;;  %p3144_p2 = por %p3143_p10, %p3142_p9 }
  0x5a   : > { %p3138_p8 = pneg %p3137_p6 }
  0x5c   : > { %p3145_p3 = pnand %p3144_p2, %p3138_p8 }
  0x5e   : > { %3148 = shalt.err (!%p3145_p3)
}
  0x5f   : > { %s4066_s11 = smov 64   ;;  %s3412_s7 = smov 4  }
  0x60   : > { %2879 = dma.hbm_to_vmem [thread:$0]  (!%p3546_p5), %s4055_s12, 2048, %s540_s22, [#allocation11], %s4066_s11, %s4066_s11, %s3412_s7  }
  0x61   : > { %s3149_s26 = scalar_lea.hbm %s4057_s14, 16 }
  0x62   : > { %p3150_p2 = scmp.ne.s32.totalorder %s4057_s14, %s3149_s26  ;;  %p3156_p12 = scmp.lt.u32.totalorder %s3149_s26, %s4057_s14 }
  0x64   : > { %p3152_p3 = pnand %p3150_p2, %p3560_p7 }
  0x66   : > { %p3153_p11 = pneg %p3152_p3 }
  0x68   : > { %p3158_p13 = pnand %p3156_p12, %p3153_p11 }
  0x6a   : > { %3161 = shalt.err (!%p3158_p13)
}
  0x6b   : > { %s3162_s1 = scalar_lea.vmem %s565_s23, 16  ;;  %s3169_s22 = scalar_lea.vmem %s565_s23, 32 }
  0x6c   : > { %p3163_p0 = scmp.ne.s32.totalorder %s565_s23, %s3162_s1  ;;  %p3170_p6 = scmp.lt.s32.totalorder %s565_s23, %s565_s23 }
  0x6d   : > { %p3171_p8 = scmp.lt.s32.totalorder %s3169_s22, %s3162_s1 }
  0x6e   : > { %p3165_p1 = pnand %p3163_p0, %p3560_p7 }
  0x6f   : > { %p3172_p9 = por %p3171_p8, %p3170_p6 }
  0x70   : > { %p3166_p4 = pneg %p3165_p1 }
  0x72   : > { %p3173_p10 = pnand %p3172_p9, %p3166_p4 }
  0x74   : > { %3176 = shalt.err (!%p3173_p10)
}
  0x75   : > { %2885 = dma.hbm_to_vmem [thread:$0]  (!%p3546_p5), %s4057_s14, 16, %s565_s23, [#allocation14]  }
  0x76   : > { %s3413_s24 = smov [#allocation16]   ;;  %s3414_s26 = smov [#allocation2]  }
  0x77   : > { %s585_s25 = sshll.u32 %s3413_s24, 4  ;;  %s463_s19 = sshll.u32 %s3414_s26, 4  ;;  %s586_s25 = int_to_ptr.vmem [resolvable:$true] %s585_s25  ;;  %s464_s19 = int_to_ptr.vmem [resolvable:$true] %s463_s19 }
  0x78   : > { %s3177_s29 = scalar_lea.hbm %s4059_s16, 1024 }
  0x79   : > { %p3178_p2 = scmp.ne.s32.totalorder %s4059_s16, %s3177_s29  ;;  %p3184_p12 = scmp.lt.u32.totalorder %s3177_s29, %s4059_s16 }
  0x7b   : > { %p3180_p3 = pnand %p3178_p2, %p3560_p7 }
  0x7d   : > { %p3181_p11 = pneg %p3180_p3 }
  0x7f   : > { %p3186_p13 = pnand %p3184_p12, %p3181_p11 }
  0x81   : > { %3189 = shalt.err (!%p3186_p13)
}
  0x82   : > { %s3190_s23 = scalar_lea.vmem %s586_s25, 1024  ;;  %p3198_p6 = scmp.lt.s32.totalorder %s586_s25, %s586_s25 }
  0x83   : > { %p3191_p0 = scmp.ne.s32.totalorder %s586_s25, %s3190_s23  ;;  %p3199_p8 = scmp.lt.s32.totalorder %s3190_s23, %s3190_s23 }
  0x85   : > { %p3193_p1 = pnand %p3191_p0, %p3560_p7  ;;  %p3200_p9 = por %p3199_p8, %p3198_p6 }
  0x87   : > { %p3194_p4 = pneg %p3193_p1 }
  0x89   : > { %p3201_p10 = pnand %p3200_p9, %p3194_p4 }
  0x8b   : > { %3204 = shalt.err (!%p3201_p10)
}
  0x8c   : > { %s4083_s27 = smov 64   ;;  %s4084_s2 = sld [smem:[#allocation28_spill]] }
  0x8d   : > { %2891 = dma.hbm_to_vmem [thread:$0]  (!%p3546_p5), %s4059_s16, 1024, %s586_s25, [#allocation17], %s4083_s27, %s4083_s27, %s3412_s7  }
  0x92   : > { %s3205_s29 = scalar_lea.hbm %s4084_s2, 512 }
  0x93   : > { %p3206_p2 = scmp.ne.s32.totalorder %s4084_s2, %s3205_s29  ;;  %p3212_p12 = scmp.lt.u32.totalorder %s3205_s29, %s4084_s2 }
  0x95   : > { %p3208_p3 = pnand %p3206_p2, %p3560_p7 }
  0x97   : > { %p3209_p11 = pneg %p3208_p3 }
  0x99   : > { %p3214_p13 = pnand %p3212_p12, %p3209_p11 }
  0x9b   : > { %3217 = shalt.err (!%p3214_p13)
}
  0x9c   : > { %s3218_s11 = scalar_lea.vmem %s464_s19, 512  ;;  %p3226_p6 = scmp.lt.s32.totalorder %s464_s19, %s464_s19 }
  0x9d   : > { %p3219_p0 = scmp.ne.s32.totalorder %s464_s19, %s3218_s11  ;;  %p3227_p8 = scmp.lt.s32.totalorder %s3218_s11, %s3218_s11 }
  0x9f   : > { %p3221_p1 = pnand %p3219_p0, %p3560_p7  ;;  %p3228_p9 = por %p3227_p8, %p3226_p6 }
  0xa1   : > { %p3222_p4 = pneg %p3221_p1 }
  0xa3   : > { %p3229_p10 = pnand %p3228_p9, %p3222_p4 }
  0xa5   : > { %3232 = shalt.err (!%p3229_p10)
}
  0xa6   : > { %2864 = dma.hbm_to_vmem [thread:$0]  (!%p3546_p5), %s4084_s2, 512, %s464_s19, [#allocation3], %s4083_s27, %s4083_s27, %s3412_s7  }
  0xa7   : > { %s3415_s26 = smov [#allocation6]   ;;  %s3416_s29 = smov [#allocation9]  }
  0xa8   : > { %s502_s21 = sshll.u32 %s3415_s26, 4  ;;  %s523_s1 = sshll.u32 %s3416_s29, 4  ;;  %s503_s21 = int_to_ptr.vmem [resolvable:$true] %s502_s21  ;;  %s524_s1 = int_to_ptr.vmem [resolvable:$true] %s523_s1 }
  0xa9   : > { %s3233_s23 = scalar_lea.hbm %s4051_s8, 16 }
  0xaa   : > { %p3234_p2 = scmp.ne.s32.totalorder %s4051_s8, %s3233_s23  ;;  %p3240_p12 = scmp.lt.u32.totalorder %s3233_s23, %s4051_s8 }
  0xac   : > { %p3236_p3 = pnand %p3234_p2, %p3560_p7 }
  0xae   : > { %p3237_p11 = pneg %p3236_p3 }
  0xb0   : > { %p3242_p13 = pnand %p3240_p12, %p3237_p11 }
  0xb2   : > { %3245 = shalt.err (!%p3242_p13)
}
  0xb3   : > { %s3246_s7 = scalar_lea.vmem %s503_s21, 16  ;;  %s3253_s19 = scalar_lea.vmem %s503_s21, 32 }
  0xb4   : > { %p3247_p0 = scmp.ne.s32.totalorder %s503_s21, %s3246_s7  ;;  %p3254_p6 = scmp.lt.s32.totalorder %s503_s21, %s503_s21 }
  0xb5   : > { %p3255_p8 = scmp.lt.s32.totalorder %s3253_s19, %s3246_s7 }
  0xb6   : > { %p3249_p1 = pnand %p3247_p0, %p3560_p7 }
  0xb7   : > { %p3256_p9 = por %p3255_p8, %p3254_p6 }
  0xb8   : > { %p3250_p4 = pneg %p3249_p1 }
  0xba   : > { %p3257_p10 = pnand %p3256_p9, %p3250_p4 }
  0xbc   : > { %3260 = shalt.err (!%p3257_p10)
}
  0xbd   : > { %2870 = dma.hbm_to_vmem [thread:$0]  (!%p3546_p5), %s4051_s8, 16, %s503_s21, [#allocation5]  }
  0xbe   : > { %s3261_s26 = scalar_lea.hbm %s4053_s10, 2048 }
  0xbf   : > { %p3262_p2 = scmp.ne.s32.totalorder %s4053_s10, %s3261_s26  ;;  %p3268_p12 = scmp.lt.u32.totalorder %s3261_s26, %s4053_s10 }
  0xc1   : > { %p3264_p3 = pnand %p3262_p2, %p3560_p7 }
  0xc3   : > { %p3265_p11 = pneg %p3264_p3 }
  0xc5   : > { %p3270_p13 = pnand %p3268_p12, %p3265_p11 }
  0xc7   : > { %3273 = shalt.err (!%p3270_p13)
}
  0xc8   : > { %s3274_s11 = scalar_lea.vmem %s524_s1, 2048  ;;  %p3282_p6 = scmp.lt.s32.totalorder %s524_s1, %s524_s1 }
  0xc9   : > { %p3275_p0 = scmp.ne.s32.totalorder %s524_s1, %s3274_s11  ;;  %p3283_p8 = scmp.lt.s32.totalorder %s3274_s11, %s3274_s11 }
  0xcb   : > { %p3277_p1 = pnand %p3275_p0, %p3560_p7  ;;  %p3284_p9 = por %p3283_p8, %p3282_p6 }
  0xcd   : > { %p3278_p4 = pneg %p3277_p1 }
  0xcf   : > { %p3285_p10 = pnand %p3284_p9, %p3278_p4 }
  0xd1   : > { %3288 = shalt.err (!%p3285_p10)
}
  0xd2   : > { %s3417_s21 = smov 128   ;;  %s3418_s25 = smov 8  }
  0xd3   : > { %2876 = dma.hbm_to_vmem [thread:$0]  (!%p3546_p5), %s4053_s10, 2048, %s524_s1, [#allocation8], %s3417_s21, %s3417_s21, %s3418_s25  }
  0xd4   : > { %s3419_s4 = smov [#allocation12]   ;;  %s3420_s9 = smov [#allocation15]  }
  0xd5   : > { %s553_s27 = sshll.u32 %s3419_s4, 4  ;;  %s575_s24 = sshll.u32 %s3420_s9, 4  ;;  %s554_s27 = int_to_ptr.vmem [resolvable:$true] %s553_s27  ;;  %s576_s24 = int_to_ptr.vmem [resolvable:$true] %s575_s24 }
  0xd6   : > { %s3289_s22 = scalar_lea.hbm %s4056_s13, 16 }
  0xd7   : > { %p3290_p2 = scmp.ne.s32.totalorder %s4056_s13, %s3289_s22  ;;  %p3296_p12 = scmp.lt.u32.totalorder %s3289_s22, %s4056_s13 }
  0xd9   : > { %p3292_p3 = pnand %p3290_p2, %p3560_p7 }
  0xdb   : > { %p3293_p11 = pneg %p3292_p3 }
  0xdd   : > { %p3298_p13 = pnand %p3296_p12, %p3293_p11 }
  0xdf   : > { %3301 = shalt.err (!%p3298_p13)
}
  0xe0   : > { %s3302_s1 = scalar_lea.vmem %s554_s27, 16  ;;  %s3309_s21 = scalar_lea.vmem %s554_s27, 32 }
  0xe1   : > { %p3303_p0 = scmp.ne.s32.totalorder %s554_s27, %s3302_s1  ;;  %p3310_p6 = scmp.lt.s32.totalorder %s554_s27, %s554_s27 }
  0xe2   : > { %p3311_p8 = scmp.lt.s32.totalorder %s3309_s21, %s3302_s1 }
  0xe3   : > { %p3305_p1 = pnand %p3303_p0, %p3560_p7 }
  0xe4   : > { %p3312_p9 = por %p3311_p8, %p3310_p6 }
  0xe5   : > { %p3306_p4 = pneg %p3305_p1 }
  0xe7   : > { %p3313_p10 = pnand %p3312_p9, %p3306_p4 }
  0xe9   : > { %3316 = shalt.err (!%p3313_p10)
}
  0xea   : > { %2882 = dma.hbm_to_vmem [thread:$0]  (!%p3546_p5), %s4056_s13, 16, %s554_s27, [#allocation11]  }
  0xeb   : > { %s3317_s4 = scalar_lea.hbm %s4058_s15, 16 }
  0xec   : > { %p3318_p2 = scmp.ne.s32.totalorder %s4058_s15, %s3317_s4  ;;  %p3324_p12 = scmp.lt.u32.totalorder %s3317_s4, %s4058_s15 }
  0xee   : > { %p3320_p3 = pnand %p3318_p2, %p3560_p7 }
  0xf0   : > { %p3321_p11 = pneg %p3320_p3 }
  0xf2   : > { %p3326_p13 = pnand %p3324_p12, %p3321_p11 }
  0xf4   : > { %3329 = shalt.err (!%p3326_p13)
}
  0xf5   : > { %s3330_s18 = scalar_lea.vmem %s576_s24, 16  ;;  %s3337_s27 = scalar_lea.vmem %s576_s24, 32 }
  0xf6   : > { %p3331_p0 = scmp.ne.s32.totalorder %s576_s24, %s3330_s18  ;;  %p3338_p6 = scmp.lt.s32.totalorder %s576_s24, %s576_s24 }
  0xf7   : > { %p3339_p8 = scmp.lt.s32.totalorder %s3337_s27, %s3330_s18 }
  0xf8   : > { %p3333_p1 = pnand %p3331_p0, %p3560_p7 }
  0xf9   : > { %p3340_p9 = por %p3339_p8, %p3338_p6 }
  0xfa   : > { %p3334_p4 = pneg %p3333_p1 }
  0xfc   : > { %p3341_p10 = pnand %p3340_p9, %p3334_p4 }
  0xfe   : > { %3344 = shalt.err (!%p3341_p10)
}
  0xff   : > { %2888 = dma.hbm_to_vmem [thread:$0]  (!%p3546_p5), %s4058_s15, 16, %s576_s24, [#allocation14]  }
 0x100   : > { %s3421_s1 = smov [#allocation18]   ;;  %s3345_s2 = scalar_lea.hbm %s4060_s17, 16 }
 0x101   : > { %s599_s21 = sshll.u32 %s3421_s1, 4  ;;  %p3346_p2 = scmp.ne.s32.totalorder %s4060_s17, %s3345_s2  ;;  %s600_s21 = int_to_ptr.vmem [resolvable:$true] %s599_s21 }
 0x102   : > { %p3352_p12 = scmp.lt.u32.totalorder %s3345_s2, %s4060_s17 }
 0x103   : > { %p3348_p3 = pnand %p3346_p2, %p3560_p7 }
 0x105   : > { %p3349_p11 = pneg %p3348_p3 }
 0x107   : > { %p3354_p13 = pnand %p3352_p12, %p3349_p11 }
 0x109   : > { %3357 = shalt.err (!%p3354_p13)
}
 0x10a   : > { %s3358_s24 = scalar_lea.vmem %s600_s21, 16  ;;  %s3365_s29 = scalar_lea.vmem %s600_s21, 32 }
 0x10b   : > { %p3359_p0 = scmp.ne.s32.totalorder %s600_s21, %s3358_s24  ;;  %p3366_p6 = scmp.lt.s32.totalorder %s600_s21, %s600_s21 }
 0x10c   : > { %p3367_p8 = scmp.lt.s32.totalorder %s3365_s29, %s3358_s24 }
 0x10d   : > { %p3361_p1 = pnand %p3359_p0, %p3560_p7 }
 0x10e   : > { %p3368_p9 = por %p3367_p8, %p3366_p6 }
 0x10f   : > { %p3362_p4 = pneg %p3361_p1 }
 0x111   : > { %p3369_p10 = pnand %p3368_p9, %p3362_p4 }
 0x113   : > { %3372 = shalt.err (!%p3369_p10)
}
 0x114   : > { %2894 = dma.hbm_to_vmem [thread:$0]  (!%p3546_p5), %s4060_s17, 16, %s600_s21, [#allocation17]  }
 0x115   : > { %p4085_p2 = scmp.ne.s32.totalorder %s4078_s0, 0 }
 0x116   : > { %p4086_p3 = scmp.eq.s32.totalorder (!%p4085_p2), %s3529_s30, 0 }
 0x117   : > { %619 = sbr.rel (%p4085_p2) target bundleno = 4598 (0x11f6), region = 92 }
 0x11e   : > { %3378 = dma.done.wait (%p4086_p3), [#allocation3], 512   ;;  %p4087_p7 = pmov %p4086_p3 }
 0x11f   : > { %p4088_p11 = pmov %p4086_p3 }
 0x120   : > { %3380 = vsyncadd (%p4087_p7), [#allocation3], 4294966784 }
 0x121   : > { %3382 = dma.done.wait (%p4088_p11), [#allocation5], 3088   ;;  %p4089_p12 = pmov %p4086_p3 }
 0x122   : > { %p4090_p13 = pmov %p4086_p3 }
 0x123   : > { %3384 = vsyncadd (%p4089_p12), [#allocation5], 4294964208 }
 0x124   : > { %3386 = dma.done.wait (%p4090_p13), [#allocation8], 2064   ;;  %p4091_p5 = pmov %p4086_p3 }
 0x125   : > { %p4092_p0 = pmov %p4086_p3 }
 0x126   : > { %3388 = vsyncadd (%p4091_p5), [#allocation8], 4294965232 }
 0x127   : > { %3390 = dma.done.wait (%p4092_p0), [#allocation11], 2064   ;;  %p4093_p1 = pmov %p4092_p0 }
 0x128   : > { %p4094_p4 = pmov %p4092_p0 }
 0x129   : > { %3392 = vsyncadd (%p4093_p1), [#allocation11], 4294965232 }
 0x12a   : > { %3394 = dma.done.wait (%p4094_p4), [#allocation14], 32   ;;  %p4095_p6 = pmov %p4092_p0 }
 0x12b   : > { %p4096_p8 = pmov %p4092_p0 }
 0x12c   : > { %3396 = vsyncadd (%p4095_p6), [#allocation14], 4294967264 }
 0x12d   : > { %3398 = dma.done.wait (%p4096_p8), [#allocation17], 1040   ;;  %p4097_p9 = pmov %p4092_p0 }
 0x12e   : > { %p711_p10 = scmp.lt.s32.totalorder %s3529_s30, 1  ;;  %v3422_v0 = vmov 0   ;;  %v3423_v1 = vmov 0.0   ;;  %s4098_s23 = sld [smem:[#allocation26_spill]]  ;;  %v2949_v3 = vld [vmem:[#allocation2] sm:$0xff]   ;;  %v2950_v4 = vld [vmem:[#allocation2 + $0x8] sm:$0xff]   ;;  %v721_v15 = vlaneseq }
 0x12f   : > { %3400 = vsyncadd (%p4097_p9), [#allocation17], 4294966256  ;;  %2948 = vset.pattern.permute.xlu0 %v3422_v0  ;;  %2677 = vmatprep.subr.bf16.mxu1 %v3423_v1  ;;  %vm3424_vm0 = vmmov 0   ;;  %v2956_v5 = vld [vmem:[#allocation4 + $0x8] ss:$12 sps:$4 sm:$0xff]   ;;  %v2952_v7 = vld [vmem:[#allocation2 + $0x18] sm:$0xff]  }
 0x130   : > { %s3807_s0 = scalar_select %p711_p10, %s3529_s30, 1  ;;  %2689 = vmatprep.subr.bf16.mxu0 %v3423_v1  ;;  %2678 = vmatpush3.bf16.msra.mxu1 %v2949_v3  ;;  %v2951_v6 = vld [vmem:[#allocation2 + $0x10] sm:$0xff]   ;;  %v2960_v9 = vld [vmem:[#allocation4 + $0x20] ss:$12 sps:$4 sm:$0xff]   ;;  %v2964_v10 = vld [vmem:[#allocation4 + $0x38] ss:$12 sps:$4 sm:$0xff]  }
 0x131   : > { %2679 = vmatprep.subr.bf16.mxu1 %v3423_v1  ;;  %2685 = vmatprep.mubr.msk.bf16.mxu1 %vm3424_vm0, %v3423_v1  ;;  %v2955_v8 = vld [vmem:[#allocation4 + $0x4] ss:$12 sps:$4 sm:$0xff]   ;;  %v2972_v12 = vld [vmem:[#allocation4 + $0x68] ss:$12 sps:$4 sm:$0xff]   ;;  %v2976_v13 = vld [vmem:[#allocation4 + $0x80] ss:$12 sps:$4 sm:$0xff]  }
 0x132   : > { %s2498_s20 = sshll.u32 %s3807_s0, 3  ;;  %2705 = vmatprep.mubr.msk.bf16.mxu0 %vm3424_vm0, %v3423_v1  ;;  %2690 = vmatpush3.bf16.msra.mxu0 %v2956_v5  ;;  %v2968_v11 = vld [vmem:[#allocation4 + $0x50] ss:$12 sps:$4 sm:$0xff]   ;;  %v2980_v14 = vld [vmem:[#allocation4 + $0x98] ss:$12 sps:$4 sm:$0xff]   ;;  %v722_v16 = vand.u32 127, %v721_v15 }
 0x133   : > { %2691 = vmatprep.subr.bf16.mxu0 %v3423_v1  ;;  %vm763_vm2 = vcmask 523264   ;;  %v2953_v19 = vld [vmem:[#allocation4] ss:$12 sps:$4 sm:$0xff]   ;;  %v2959_v21 = vld [vmem:[#allocation4 + $0x1c] ss:$12 sps:$4 sm:$0xff]   ;;  %v3845_v43 = vshrl.u32 %v721_v15, 7 }
 0x134   : > { %s714_s11 = scalar_lea.vmem %s4098_s23, %s2498_s20  ;;  %2680 = vmatpush3.bf16.msra.mxu1 %v2950_v4  ;;  %v2957_v22 = vld [vmem:[#allocation4 + $0x18] ss:$12 sps:$4 sm:$0xff]   ;;  %v2963_v23 = vld [vmem:[#allocation4 + $0x34] ss:$12 sps:$4 sm:$0xff]   ;;  %v2961_v24 = vld [vmem:[#allocation4 + $0x30] ss:$12 sps:$4 sm:$0xff]  }
 0x135   : > { %v720_v2 = vld [vmem:[%s714_s11] sm:$0xff]  ;;  %2681 = vmatprep.subr.bf16.mxu1 %v3423_v1  ;;  %v2967_v25 = vld [vmem:[#allocation4 + $0x4c] ss:$12 sps:$4 sm:$0xff]   ;;  %v2965_v26 = vld [vmem:[#allocation4 + $0x48] ss:$12 sps:$4 sm:$0xff]   ;;  %v3848_v44 = vsub.s32 0, %v3845_v43 }
 0x136   : > { %724 = vperm.xlu0 %2948, %v720_v2   ;;  %2692 = vmatpush3.bf16.msra.mxu0 %v2960_v9  ;;  %v2971_v27 = vld [vmem:[#allocation4 + $0x64] ss:$12 sps:$4 sm:$0xff]   ;;  %v2969_v28 = vld [vmem:[#allocation4 + $0x60] ss:$12 sps:$4 sm:$0xff]   ;;  %v2975_v29 = vld [vmem:[#allocation4 + $0x7c] ss:$12 sps:$4 sm:$0xff]  }
 0x137   : > { %2693 = vmatprep.subr.bf16.mxu0 %v3423_v1  ;;  %v2973_v30 = vld [vmem:[#allocation4 + $0x78] ss:$12 sps:$4 sm:$0xff]   ;;  %v2979_v31 = vld [vmem:[#allocation4 + $0x94] ss:$12 sps:$4 sm:$0xff]   ;;  %v2977_v32 = vld [vmem:[#allocation4 + $0x90] ss:$12 sps:$4 sm:$0xff]  }
 0x138   : > { %2682 = vmatpush3.bf16.msra.mxu1 %v2951_v6  ;;  %v2983_v33 = vld [vmem:[#allocation4 + $0xac] ss:$12 sps:$4 sm:$0xff]   ;;  %v2981_v34 = vld [vmem:[#allocation4 + $0xa8] ss:$12 sps:$4 sm:$0xff]   ;;  %v2984_v35 = vld [vmem:[#allocation4 + $0xb0] ss:$12 sps:$4 sm:$0xff]  }
 0x139   : > { %2683 = vmatprep.subr.bf16.mxu1 %v3423_v1  ;;  %v738_v36 = vld [vmem:[%s4046_s3] sm:$0xff]  ;;  %v856_v46 = vsub.s32 1, %v3845_v43  ;;  %s3425_s2 = smov 96   ;;  %v860_v61 = vsub.s32 2, %v3845_v43  ;;  %vm1116_vm3 = vcmask 261120   ;;  %vm1178_vm4 = vcmask 1043456  }
 0x13a   : > { %2694 = vmatpush3.bf16.msra.mxu0 %v2964_v10  ;;  %v848_v45 = vld [vmem:[%s4048_s5] sm:$0x7]  ;;  %s4099_s9 = sld [smem:[#allocation27_spill]]  ;;  %vm1162_vm5 = vcmask 64512   ;;  %s3427_s1 = smov 32  }
 0x13b   : > { %2695 = vmatprep.subr.bf16.mxu0 %v3423_v1  ;;  %v853_v47 = vrot.slane %v848_v45, %v3848_v44  ;;  %v857_v48 = vrot.slane %v848_v45, %v856_v46  ;;  %v861_v2 = vrot.slane %v848_v45, %v860_v61  ;;  %s4100_s29 = sld [smem:[#allocation30_spill]]  ;;  %s4101_s28 = sld [smem:[#allocation32_spill]] }
 0x13c   : > { %2684 = vmatpush3.bf16.msra.mxu1 %v2952_v7  ;;  %s4102_s11 = sld [smem:[#allocation33_spill]] }
 0x13d   : > { %993 = vmatprep.subr.bf16.mxu1 %v2955_v8 }
 0x13e   : > { %2696 = vmatpush3.bf16.msra.mxu0 %v2968_v11 }
 0x13f   : > { %2697 = vmatprep.subr.bf16.mxu0 %v3423_v1 }
 0x140   : > { %s807_s26 = scalar_lea.vmem %s4099_s9, %s3529_s30  ;;  %s3426_s30 = smov 64  }
 0x142   : > { %2698 = vmatpush3.bf16.msra.mxu0 %v2972_v12 }
 0x143   : > { %2699 = vmatprep.subr.bf16.mxu0 %v3423_v1 }
 0x146   : > { %2700 = vmatpush3.bf16.msra.mxu0 %v2976_v13 }
 0x147   : > { %2701 = vmatprep.subr.bf16.mxu0 %v3423_v1 }
 0x14a   : > { %2702 = vmatpush3.bf16.msra.mxu0 %v2980_v14 }
 0x14b   : > { %2703 = vmatprep.subr.bf16.mxu0 %v3423_v1 }
 0x14e   : > { %2704 = vmatpush3.bf16.msra.mxu0 %v2984_v35 }
 0x14f   : > { %2723 = vmatprep.subr.bf16.mxu0 %v3423_v1 }
 0x1b5   : > { %v725_v17 = vpop.permute.xlu0 %724 }
 0x1b6   : > { %vm726_vm1 = vcmp.eq.s32.totalorder %v722_v16, %v725_v17 }
 0x1b7   : > { %v2500_v18 = vsel %vm726_vm1, 1.0, %v3423_v1 }
 0x1b8   : > { %v729_v20 = vpack.c.bf16 %v2500_v18, %v2500_v18 }
 0x1ba   : > { %2686 = vmatmul.mubr.msk.bf16.vlgmr.msra.gmra.mrb[0].mxu1 %vm763_vm2, %v729_v20 }
 0x1bb   : > { %994 = vmatpush1.bf16.msra.mxu1 %v2953_v19  ;;  %1025 = vmatprep.mubr.bf16.mxu1 %v3422_v0 }
 0x1bc   : > { %995 = vmatprep.subr.bf16.mxu1 %v2959_v21 }
 0x1bf   : > { %996 = vmatpush1.bf16.msra.mxu1 %v2957_v22 }
 0x1c0   : > { %997 = vmatprep.subr.bf16.mxu1 %v2963_v23 }
 0x1c3   : > { %998 = vmatpush1.bf16.msra.mxu1 %v2961_v24 }
 0x1c4   : > { %999 = vmatprep.subr.bf16.mxu1 %v2967_v25  ;;  %v808_v25 = vld [vmem:[%s807_s26] sm:$0x1] }
 0x1c7   : > { %1000 = vmatpush1.bf16.msra.mxu1 %v2965_v26  ;;  %v2506_v26 = vadd.f32 -1.0, %v808_v25 }
 0x1c8   : > { %1001 = vmatprep.subr.bf16.mxu1 %v2971_v27 }
 0x1c9   : > { %v810_v27 = vmul.f32 1e+09, %v2506_v26 }
 0x1cb   : > { %1002 = vmatpush1.bf16.msra.mxu1 %v2969_v28  ;;  %v3901_v28 = vrot.slane %v810_v27, %v3848_v44 }
 0x1cc   : > { %1003 = vmatprep.subr.bf16.mxu1 %v2975_v29 }
 0x1cf   : > { %1004 = vmatpush1.bf16.msra.mxu1 %v2973_v30 }
 0x1d0   : > { %1005 = vmatprep.subr.bf16.mxu1 %v2979_v31 }
 0x1d3   : > { %1006 = vmatpush1.bf16.msra.mxu1 %v2977_v32 }
 0x1d4   : > { %1007 = vmatprep.subr.bf16.mxu1 %v2983_v33 }
 0x1d7   : > { %1008 = vmatpush1.bf16.msra.mxu1 %v2981_v34 }
 0x1d8   : > { %2709 = vmatprep.subr.bf16.mxu1 %v3423_v1 }
 0x28d   : > { %v801_v37 = vpop.f32.mrb[0].mxu1 }
 0x28e   : > { %v3837_v38 = vadd.f32 %v801_v37, %v738_v36  ;;  %v2687_v39 = vpop.f32.mrb[1].mxu1 }
 0x28f   : > { %v804_v40 = vpop.f32.mrb[2].mxu1 }
 0x290   : > { %v815_v41 = vpack.c.bf16 %v3837_v38, %v3837_v38  ;;  %v2688_v42 = vpop.f32.mrb[3].mxu1 }
 0x292   : > { %1026 = vmatmul.mubr.bf16.vlgmr.msra.gmra.mrb[4].mxu1 %v815_v41  ;;  %2706 = vmatmul.mubr.bf16.vlgmr.msra.gmra.mrb[0].mxu0 %v815_v41 }
 0x293   : > { %2713 = vmatprep.mubr.msk.bf16.mxu1 %vm3424_vm0, %v3423_v1  ;;  %2727 = vmatprep.mubr.msk.bf16.mxu0 %vm3424_vm0, %v3423_v1 }
 0x365   : > { %v1027_v49 = vpop.f32.mrb[4].mxu1  ;;  %v1068_v50 = vpop.f32.mrb[0].mxu0 }
 0x366   : > { %v1028_v51 = vadd.f32 %v1027_v49, %v853_v47  ;;  %v1029_v52 = vpop.f32.mrb[5].mxu1  ;;  %v2707_v53 = vpop.f32.mrb[1].mxu0  ;;  %v1069_v4 = vadd.f32 %v1068_v50, %v861_v2 }
 0x367   : > { %v1031_v54 = vpop.f32.mrb[6].mxu1  ;;  %v1071_v55 = vpop.f32.mrb[2].mxu0  ;;  %v1030_v56 = vadd.f32 %v1029_v52, %v857_v48 }
 0x368   : > { %v3857_v57 = vpack.c.bf16 %v1028_v51, %v1028_v51  ;;  %v1032_v58 = vpop.f32.mrb[7].mxu1  ;;  %v2708_v59 = vpop.f32.mrb[3].mxu0  ;;  %v3863_v7 = vpack.c.bf16 %v1069_v4, %v1069_v4 }
 0x369   : > { %1076 = vxpose.xlu1.b32.start.end [1/1] (short) %v1030_v56, 128 }
 0x36a   : > { %1228 = vrot.lane.b32.xlu0 %v3857_v57, %s3425_s2  ;;  %v1180_v9 = vsel %vm1178_vm4, %v3863_v7, 0 }
 0x3dc   : > { %v1229_v15 = vpop.permute.xlu0 %1228 }
 0x3e9   : > { %v1092_v60 = vpop.trf.xlu1 }
 0x3ed   : > { %v1093_v62 = vpop.trf.xlu1 }
 0x3ee   : > { %v1108_v63 = vpack.c.bf16 %v1093_v62, %v1092_v60 }
 0x3f0   : > { %2710 = vmatpush3.bf16.msra.mxu1 %v1108_v63 }
 0x3f1   : > { %v1094_v3 = vpop.trf.xlu1  ;;  %2711 = vmatprep.subr.bf16.mxu1 %v3423_v1 }
 0x3f5   : > { %v1095_v5 = vpop.trf.xlu1 }
 0x3f6   : > { %v1109_v6 = vpack.c.bf16 %v1095_v5, %v1094_v3 }
 0x3f8   : > { %2712 = vmatpush3.bf16.msra.mxu1 %v1109_v6 }
 0x3f9   : > { %v1096_v8 = vpop.trf.xlu1  ;;  %2717 = vmatprep.subr.bf16.mxu1 %v3423_v1 }
 0x3fb   : > { %2714 = vmatmul.mubr.msk.bf16.vlgmr.msra.gmra.mrb[8].mxu1 %vm1116_vm3, %v3857_v57 }
 0x3fc   : > { %2718 = vmatpush3.bf16.msra.mxu1 %v1180_v9  ;;  %2719 = vmatprep.mubr.msk.bf16.mxu1 %vm3424_vm0, %v3423_v1 }
 0x3fd   : > { %v1097_v10 = vpop.trf.xlu1  ;;  %2731 = vmatprep.subr.bf16.mxu1 %v3423_v1 }
 0x3fe   : > { %v1110_v11 = vpack.c.bf16 %v1097_v10, %v1096_v8  ;;  %v2985_v8 = vld [vmem:[%s4049_s6] sm:$0xff]   ;;  %v2986_v10 = vld [vmem:[%s4049_s6 + $0x8] sm:$0xff]  }
 0x400   : > { %2724 = vmatpush3.bf16.msra.mxu0 %v1110_v11  ;;  %v2987_v11 = vld [vmem:[%s4049_s6 + $0x10] sm:$0xff]  }
 0x401   : > { %v1098_v12 = vpop.trf.xlu1  ;;  %2725 = vmatprep.subr.bf16.mxu0 %v3423_v1 }
 0x405   : > { %v1099_v13 = vpop.trf.xlu1 }
 0x406   : > { %v1111_v14 = vpack.c.bf16 %v1099_v13, %v1098_v12  ;;  %v2988_v12 = vld [vmem:[%s4049_s6 + $0x18] sm:$0xff]  }
 0x408   : > { %2726 = vmatpush3.bf16.msra.mxu0 %v1111_v14 }
 0x409   : > { %2737 = vmatprep.subr.bf16.mxu0 %v3423_v1  ;;  %v3878_v16 = vpop.trf.xlu1 }
 0x40b   : > { %2728 = vmatmul.mubr.msk.bf16.vlgmr.msra.gmra.mrb[4].mxu0 %vm1116_vm3, %v1229_v15 }
 0x40c   : > { %2741 = vmatprep.mubr.msk.bf16.mxu0 %vm3424_vm0, %v3423_v1  ;;  %2738 = vmatpush3.bf16.msra.mxu0 %v2987_v11 }
 0x40d   : > { %v3880_v17 = vpop.trf.xlu1  ;;  %2739 = vmatprep.subr.bf16.mxu0 %v3423_v1 }
 0x40e   : > { %v1112_v18 = vpack.c.bf16 %v3880_v17, %v3878_v16 }
 0x410   : > { %2740 = vmatpush3.bf16.msra.mxu0 %v2988_v12 }
 0x411   : > { %v3884_v19 = vpop.trf.xlu1  ;;  %2753 = vmatprep.subr.bf16.mxu0 %v3423_v1 }
 0x415   : > { %v3886_v20 = vpop.trf.xlu1 }
 0x416   : > { %v1113_v21 = vpack.c.bf16 %v3886_v20, %v3884_v19 }
 0x419   : > { %v3890_v22 = vpop.trf.xlu1 }
 0x41d   : > { %v3892_v23 = vpop.trf.xlu1 }
 0x41e   : > { %v1114_v24 = vpack.c.bf16 %v3892_v23, %v3890_v22  ;;  %v2990_v22 = vld [vmem:[%s4049_s6 + $0x28] sm:$0xff]  }
 0x421   : > { %v3907_v47 = vpop.trf.xlu1 }
 0x425   : > { %v3909_v48 = vpop.trf.xlu1 }
 0x4ce   : > { %v1154_v29 = vpop.f32.mrb[8].mxu1 }
 0x4cf   : > { %v1160_v30 = vmul.f32 0.17677669, %v1154_v29  ;;  %v2715_v31 = vpop.f32.mrb[9].mxu1 }
 0x4d0   : > { %v1157_v32 = vpop.f32.mrb[10].mxu1 }
 0x4d1   : > { %v2716_v33 = vpop.f32.mrb[11].mxu1  ;;  %v1161_v34 = vadd.f32 %v1160_v30, %v3901_v28 }
 0x4d3   : > { %v1163_v35 = vsel %vm1162_vm5, %v1161_v34, -inf }
 0x4d4   : > { %1164 = vmax.xlane.f32.xlu1 %v1163_v35 }
 0x4de   : > { %v1267_v36 = vpop.f32.mrb[4].mxu0 }
 0x4df   : > { %v1273_v37 = vmul.f32 0.17677669, %v1267_v36  ;;  %v2729_v39 = vpop.f32.mrb[5].mxu0 }
 0x4e0   : > { %v1270_v40 = vpop.f32.mrb[6].mxu0 }
 0x4e1   : > { %v2730_v41 = vpop.f32.mrb[7].mxu0  ;;  %v1274_v42 = vadd.f32 %v1273_v37, %v3901_v28 }
 0x4e3   : > { %v1275_v45 = vsel %vm1162_vm5, %v1274_v42, -inf }
 0x4e4   : > { %1276 = vmax.xlane.f32.xlu0 %v1275_v45 }
 0x561   : > { %v1165_v49 = vpop.xlane.xlu1 %1164 }
 0x562   : > { %v1166_v50 = vsub.f32 %v1161_v34, %v1165_v49 }
 0x564   : > { %v1167_v51 = vmul.f32 1.442695, %v1166_v50 }
 0x566   : > { %3041 = vpow2.f32 %v1167_v51 }
 0x570   : > { %v3042_v52 = vpop.eup %3041 }
 0x571   : > { %v1277_v53 = vpop.xlane.xlu0 %1276  ;;  %v1169_v54 = vsel %vm1162_vm5, %v3042_v52, 0.0 }
 0x572   : > { %v1278_v55 = vsub.f32 %v1274_v42, %v1277_v53  ;;  %1170 = vadd.xlane.f32.xlu0 %v1169_v54 }
 0x574   : > { %v1279_v56 = vmul.f32 1.442695, %v1278_v55 }
 0x576   : > { %3043 = vpow2.f32 %v1279_v56 }
 0x580   : > { %v3044_v58 = vpop.eup %3043 }
 0x581   : > { %v1281_v59 = vsel %vm1162_vm5, %v3044_v58, 0.0 }
 0x582   : > { %1282 = vadd.xlane.f32.xlu0 %v1281_v59 }
 0x598   : > { %1288 = vrot.lane.b32.xlu0 %v3863_v7, %s3425_s2 }
 0x59c   : > { %1451 = vrot.lane.b32.xlu0 %v3857_v57, %s3426_s30 }
 0x5ff   : > { %v1171_v60 = vpop.xlane.xlu0 %1170 }
 0x600   : > { %3045 = vrcp.f32 %v1171_v60 }
 0x60a   : > { %v3046_v61 = vpop.eup %3045 }
 0x60b   : > { %v1173_v62 = vmul.f32 %v3046_v61, %v3042_v52 }
 0x60d   : > { %v1174_v63 = vpack.c.bf16 %v1173_v62, %v1173_v62 }
 0x60f   : > { %2720 = vmatmul.mubr.msk.bf16.vlgmr.msra.gmra.mrb[12].mxu1 %vm1162_vm5, %v1174_v63  ;;  %v1283_v2 = vpop.xlane.xlu0 %1282 }
 0x610   : > { %3047 = vrcp.f32 %v1283_v2  ;;  %2733 = vmatprep.mubr.msk.bf16.mxu1 %vm3424_vm0, %v3423_v1 }
 0x613   : > { %v1289_v3 = vpop.permute.xlu0 %1288 }
 0x614   : > { %v1294_v4 = vsel %vm1178_vm4, %v1289_v3, 0 }
 0x615   : > { %2732 = vmatpush3.bf16.msra.mxu1 %v1294_v4 }
 0x616   : > { %2745 = vmatprep.subr.bf16.mxu1 %v3423_v1 }
 0x617   : > { %v1452_v33 = vpop.permute.xlu0 %1451 }
 0x61a   : > { %v3048_v5 = vpop.eup %3047 }
 0x61b   : > { %v1285_v6 = vmul.f32 %v3048_v5, %v3044_v58  ;;  %v2989_v58 = vld [vmem:[%s4049_s6 + $0x20] sm:$0xff]  }
 0x61d   : > { %v1286_v9 = vpack.c.bf16 %v1285_v6, %v1285_v6 }
 0x61f   : > { %2734 = vmatmul.mubr.msk.bf16.vlgmr.msra.gmra.mrb[16].mxu1 %vm1162_vm5, %v1286_v9 }
 0x620   : > { %2746 = vmatpush3.bf16.msra.mxu1 %v2985_v8  ;;  %2749 = vmatprep.mubr.msk.bf16.mxu1 %vm3424_vm0, %v3423_v1 }
 0x621   : > { %2747 = vmatprep.subr.bf16.mxu1 %v3423_v1 }
 0x624   : > { %2748 = vmatpush3.bf16.msra.mxu1 %v2986_v10 }
 0x625   : > { %2761 = vmatprep.subr.bf16.mxu1 %v3423_v1 }
 0x6e2   : > { %v1216_v13 = vpop.f32.mrb[12].mxu1 }
 0x6e3   : > { %v1222_v14 = vpack.c.bf16 %v1216_v13, %v1216_v13  ;;  %v2721_v15 = vpop.f32.mrb[13].mxu1 }
 0x6e4   : > { %v1219_v25 = vpop.f32.mrb[14].mxu1 }
 0x6e5   : > { %v2722_v26 = vpop.f32.mrb[15].mxu1  ;;  %2750 = vmatmul.mubr.msk.bf16.vlgmr.msra.gmra.mrb[20].mxu1 %vm1116_vm3, %v1222_v14  ;;  %v2991_v25 = vld [vmem:[%s4049_s6 + $0x30] sm:$0xff]  }
 0x6e6   : > { %2763 = vmatprep.mubr.msk.bf16.mxu1 %vm3424_vm0, %v3423_v1 }
 0x6f2   : > { %v1330_v27 = vpop.f32.mrb[16].mxu1 }
 0x6f3   : > { %v1336_v29 = vpack.c.bf16 %v1330_v27, %v1330_v27  ;;  %v2735_v30 = vpop.f32.mrb[17].mxu1 }
 0x6f4   : > { %v1333_v31 = vpop.f32.mrb[18].mxu1 }
 0x6f5   : > { %v2736_v32 = vpop.f32.mrb[19].mxu1  ;;  %2742 = vmatmul.mubr.msk.bf16.vlgmr.msra.gmra.mrb[8].mxu0 %vm1116_vm3, %v1336_v29 }
 0x6f6   : > { %2754 = vmatpush3.bf16.msra.mxu0 %v1112_v18  ;;  %2757 = vmatprep.mubr.msk.bf16.mxu0 %vm3424_vm0, %v3423_v1 }
 0x6f7   : > { %2755 = vmatprep.subr.bf16.mxu0 %v3423_v1 }
 0x6fa   : > { %2756 = vmatpush3.bf16.msra.mxu0 %v1113_v21 }
 0x6fb   : > { %2767 = vmatprep.subr.bf16.mxu0 %v3423_v1 }
 0x6fd   : > { %2758 = vmatmul.mubr.msk.bf16.vlgmr.msra.gmra.mrb[12].mxu0 %vm1116_vm3, %v1452_v33 }
 0x6fe   : > { %2771 = vmatprep.mubr.msk.bf16.mxu0 %vm3424_vm0, %v3423_v1  ;;  %2768 = vmatpush3.bf16.msra.mxu0 %v2989_v58 }
 0x6ff   : > { %2769 = vmatprep.subr.bf16.mxu0 %v3423_v1 }
 0x702   : > { %2770 = vmatpush3.bf16.msra.mxu0 %v2990_v22  ;;  %v3013_v22 = vld [vmem:[#allocation9 + $0x64] ss:$8 sps:$4 sm:$0xff]  }
 0x703   : > { %2783 = vmatprep.subr.bf16.mxu0 %v3423_v1 }
 0x7b8   : > { %v1445_v34 = vpop.f32.mrb[20].mxu1 }
 0x7b9   : > { %v2751_v16 = vpop.f32.mrb[21].mxu1 }
 0x7ba   : > { %v1448_v17 = vpop.f32.mrb[22].mxu1 }
 0x7bb   : > { %v2752_v18 = vpop.f32.mrb[23].mxu1  ;;  %v2992_v17 = vld [vmem:[%s4049_s6 + $0x38] sm:$0xff]  }
 0x7c8   : > { %v1390_v35 = vpop.f32.mrb[8].mxu0 }
 0x7c9   : > { %v3958_v36 = vadd.f32 %v1445_v34, %v1390_v35  ;;  %v2743_v37 = vpop.f32.mrb[9].mxu0 }
 0x7ca   : > { %v1393_v39 = vpop.f32.mrb[10].mxu0 }
 0x7cb   : > { %v2744_v40 = vpop.f32.mrb[11].mxu0 }
 0x7d0   : > { %v1490_v19 = vpop.f32.mrb[12].mxu0 }
 0x7d1   : > { %v1496_v20 = vmul.f32 0.17677669, %v1490_v19  ;;  %v2759_v21 = vpop.f32.mrb[13].mxu0  ;;  %v2551_v19 = vld [vmem:[%s4100_s29] ss:$0 sm:$0xff] }
 0x7d2   : > { %v1493_v41 = vpop.f32.mrb[14].mxu0 }
 0x7d3   : > { %v2760_v42 = vpop.f32.mrb[15].mxu0  ;;  %v1497_v45 = vadd.f32 %v1496_v20, %v3901_v28 }
 0x7d5   : > { %v1498_v49 = vsel %vm1162_vm5, %v1497_v45, -inf }
 0x7d6   : > { %1499 = vmax.xlane.f32.xlu0 %v1498_v49  ;;  %v2993_v49 = vld [vmem:[#allocation9] ss:$8 sps:$4 sm:$0xff]  }
 0x7ec   : > { %1510 = vrot.lane.b32.xlu0 %v3863_v7, %s3426_s30 }
 0x863   : > { %v1500_v50 = vpop.xlane.xlu0 %1499 }
 0x864   : > { %v1501_v51 = vsub.f32 %v1497_v45, %v1500_v50  ;;  %v2995_v50 = vld [vmem:[#allocation9 + $0x4] ss:$8 sps:$4 sm:$0xff]  }
 0x866   : > { %v1502_v52 = vmul.f32 1.442695, %v1501_v51  ;;  %v2998_v51 = vld [vmem:[#allocation9 + $0x14] ss:$8 sps:$4 sm:$0xff]  }
 0x867   : > { %v1511_v53 = vpop.permute.xlu0 %1510 }
 0x868   : > { %3049 = vpow2.f32 %v1502_v52  ;;  %v1516_v54 = vsel %vm1178_vm4, %v1511_v53, 0  ;;  %v2996_v52 = vld [vmem:[#allocation9 + $0x10] ss:$8 sps:$4 sm:$0xff]   ;;  %v3001_v53 = vld [vmem:[#allocation9 + $0x24] ss:$8 sps:$4 sm:$0xff]  }
 0x869   : > { %2762 = vmatpush3.bf16.msra.mxu1 %v1516_v54  ;;  %v2999_v54 = vld [vmem:[#allocation9 + $0x20] ss:$8 sps:$4 sm:$0xff]  }
 0x86a   : > { %2775 = vmatprep.subr.bf16.mxu1 %v3423_v1 }
 0x872   : > { %v3050_v55 = vpop.eup %3049 }
 0x873   : > { %v1504_v56 = vsel %vm1162_vm5, %v3050_v55, 0.0 }
 0x874   : > { %1505 = vadd.xlane.f32.xlu1 %v1504_v56 }
 0x885   : > { %1619 = vrot.lane.b32.xlu1 %v3857_v57, %s3427_s1  ;;  %v1115_v57 = vpack.c.bf16 %v3909_v48, %v3907_v47 }
 0x901   : > { %v1506_v59 = vpop.xlane.xlu1 %1505 }
 0x902   : > { %3051 = vrcp.f32 %v1506_v59 }
 0x905   : > { %v1620_v63 = vpop.permute.xlu1 %1619 }
 0x90c   : > { %v3052_v60 = vpop.eup %3051 }
 0x90d   : > { %v1508_v61 = vmul.f32 %v3052_v60, %v3050_v55  ;;  %v3004_v60 = vld [vmem:[#allocation9 + $0x34] ss:$8 sps:$4 sm:$0xff]  }
 0x90f   : > { %v1509_v62 = vpack.c.bf16 %v1508_v61, %v1508_v61  ;;  %v3007_v61 = vld [vmem:[#allocation9 + $0x44] ss:$8 sps:$4 sm:$0xff]  }
 0x911   : > { %2764 = vmatmul.mubr.msk.bf16.vlgmr.msra.gmra.mrb[24].mxu1 %vm1162_vm5, %v1509_v62  ;;  %v3005_v62 = vld [vmem:[#allocation9 + $0x40] ss:$8 sps:$4 sm:$0xff]  }
 0x912   : > { %2776 = vmatpush3.bf16.msra.mxu1 %v1114_v24  ;;  %2779 = vmatprep.mubr.msk.bf16.mxu1 %vm3424_vm0, %v3423_v1 }
 0x913   : > { %2777 = vmatprep.subr.bf16.mxu1 %v3423_v1 }
 0x916   : > { %2778 = vmatpush3.bf16.msra.mxu1 %v1115_v57  ;;  %v3010_v57 = vld [vmem:[#allocation9 + $0x54] ss:$8 sps:$4 sm:$0xff]  }
 0x917   : > { %2789 = vmatprep.subr.bf16.mxu1 %v3423_v1 }
 0x919   : > { %2780 = vmatmul.mubr.msk.bf16.vlgmr.msra.gmra.mrb[28].mxu1 %vm1116_vm3, %v1620_v63  ;;  %v3008_v63 = vld [vmem:[#allocation9 + $0x50] ss:$8 sps:$4 sm:$0xff]  }
 0x91a   : > { %2793 = vmatprep.mubr.msk.bf16.mxu1 %vm3424_vm0, %v3423_v1  ;;  %2790 = vmatpush3.bf16.msra.mxu1 %v2991_v25  ;;  %v3021_v25 = vld [vmem:[#allocation10 + $0x50] sm:$0xff]  }
 0x91b   : > { %2791 = vmatprep.subr.bf16.mxu1 %v3423_v1 }
 0x91e   : > { %2792 = vmatpush3.bf16.msra.mxu1 %v2992_v17  ;;  %v1841_v17 = vld [vmem:[%s4101_s28] sm:$0x3] }
 0x9e4   : > { %v1552_v23 = vpop.f32.mrb[24].mxu1 }
 0x9e5   : > { %v1558_v24 = vpack.c.bf16 %v1552_v23, %v1552_v23  ;;  %v2765_v2 = vpop.f32.mrb[25].mxu1  ;;  %v3011_v23 = vld [vmem:[#allocation9 + $0x60] ss:$8 sps:$4 sm:$0xff]  }
 0x9e6   : > { %v1555_v47 = vpop.f32.mrb[26].mxu1  ;;  %v3014_v2 = vld [vmem:[#allocation9 + $0x70] ss:$8 sps:$4 sm:$0xff]  }
 0x9e7   : > { %v2766_v48 = vpop.f32.mrb[27].mxu1  ;;  %2772 = vmatmul.mubr.msk.bf16.vlgmr.msra.gmra.mrb[16].mxu0 %vm1116_vm3, %v1558_v24  ;;  %v3016_v24 = vld [vmem:[#allocation9 + $0x74] ss:$8 sps:$4 sm:$0xff]  }
 0x9e8   : > { %2785 = vmatprep.mubr.msk.bf16.mxu0 %vm3424_vm0, %v3423_v1 }
 0x9ec   : > { %v1658_v3 = vpop.f32.mrb[28].mxu1 }
 0x9ed   : > { %v1664_v4 = vmul.f32 0.17677669, %v1658_v3  ;;  %v2781_v5 = vpop.f32.mrb[29].mxu1 }
 0x9ee   : > { %v1661_v6 = vpop.f32.mrb[30].mxu1  ;;  %v2552_v5 = vld [vmem:[#allocation6] ss:$0 sm:$0xff] }
 0x9ef   : > { %v2782_v8 = vpop.f32.mrb[31].mxu1  ;;  %v1665_v9 = vadd.f32 %v1664_v4, %v3901_v28 }
 0x9f0   : > { %v2553_v8 = vld [vmem:[#allocation7] ss:$0 sm:$0xff] }
 0x9f1   : > { %v1666_v10 = vsel %vm1162_vm5, %v1665_v9, -inf }
 0x9f2   : > { %1667 = vmax.xlane.f32.xlu1 %v1666_v10 }
 0xa7f   : > { %v1668_v11 = vpop.xlane.xlu1 %1667 }
 0xa80   : > { %v1669_v12 = vsub.f32 %v1665_v9, %v1668_v11 }
 0xa82   : > { %v1670_v13 = vmul.f32 1.442695, %v1669_v12  ;;  %v3017_v12 = vld [vmem:[#allocation10 + $0x40] sm:$0xff]  }
 0xa83   : > { %2646 = vmatprep.subr.bf16.mxu1 %v3017_v12  ;;  %v3039_v12 = vld [vmem:[#allocation16 + $0x30] sm:$0xff]  }
 0xa84   : > { %3053 = vpow2.f32 %v1670_v13  ;;  %v3018_v13 = vld [vmem:[#allocation10] sm:$0xff]  }
 0xa8e   : > { %v3054_v14 = vpop.eup %3053 }
 0xa8f   : > { %v1672_v15 = vsel %vm1162_vm5, %v3054_v14, 0.0 }
 0xa90   : > { %1673 = vadd.xlane.f32.xlu0 %v1672_v15  ;;  %v3020_v15 = vld [vmem:[#allocation10 + $0x8] sm:$0xff]  }
 0xaa6   : > { %1678 = vrot.lane.b32.xlu0 %v3863_v7, %s3427_s1  ;;  %s718_s1 = scalar_lea.vmem %s4102_s11, %s2498_s20 }
 0xaba   : > { %v1612_v28 = vpop.f32.mrb[16].mxu0 }
 0xabb   : > { %v1618_v26 = vadd.f32 %v1612_v28, %v3958_v36  ;;  %v2773_v27 = vpop.f32.mrb[17].mxu0  ;;  %v3022_v28 = vld [vmem:[#allocation10 + $0x10] sm:$0xff]  }
 0xabc   : > { %v1615_v29 = vpop.f32.mrb[18].mxu0  ;;  %v3024_v27 = vld [vmem:[#allocation10 + $0x18] sm:$0xff]  }
 0xabd   : > { %v2774_v30 = vpop.f32.mrb[19].mxu0  ;;  %v3025_v29 = vld [vmem:[#allocation10 + $0x60] sm:$0xff]  }
 0xabe   : > { %v3026_v30 = vld [vmem:[#allocation10 + $0x20] sm:$0xff]  }
 0xb1d   : > { %v1674_v31 = vpop.xlane.xlu0 %1673 }
 0xb1e   : > { %3055 = vrcp.f32 %v1674_v31  ;;  %v3027_v31 = vld [vmem:[#allocation10 + $0x68] sm:$0xff]  }
 0xb21   : > { %v1679_v32 = vpop.permute.xlu0 %1678 }
 0xb22   : > { %v1684_v33 = vsel %vm1178_vm4, %v1679_v32, 0  ;;  %v3028_v32 = vld [vmem:[#allocation10 + $0x28] sm:$0xff]  }
 0xb23   : > { %2784 = vmatpush3.bf16.msra.mxu0 %v1684_v33  ;;  %v3029_v33 = vld [vmem:[#allocation10 + $0x70] sm:$0xff]  }
 0xb24   : > { %1933 = vmatprep.subr.bf16.mxu0 %v2995_v50 }
 0xb28   : > { %v3056_v7 = vpop.eup %3055 }
 0xb29   : > { %v1676_v34 = vmul.f32 %v3056_v7, %v3054_v14  ;;  %v3019_v14 = vld [vmem:[#allocation10 + $0x48] sm:$0xff]   ;;  %v3030_v7 = vld [vmem:[#allocation10 + $0x30] sm:$0xff]  }
 0xb2b   : > { %v1677_v16 = vpack.c.bf16 %v1676_v34, %v1676_v34  ;;  %v3031_v34 = vld [vmem:[#allocation10 + $0x78] sm:$0xff]  }
 0xb2d   : > { %2786 = vmatmul.mubr.msk.bf16.vlgmr.msra.gmra.mrb[20].mxu0 %vm1162_vm5, %v1677_v16  ;;  %v3032_v16 = vld [vmem:[#allocation10 + $0x38] sm:$0xff]  }
 0xb2e   : > { %1965 = vmatprep.mubr.bf16.mxu0 %v3422_v0  ;;  %1934 = vmatpush1.bf16.msra.mxu0 %v2993_v49 }
 0xb2f   : > { %1935 = vmatprep.subr.bf16.mxu0 %v2998_v51 }
 0xb32   : > { %1936 = vmatpush1.bf16.msra.mxu0 %v2996_v52 }
 0xb33   : > { %1937 = vmatprep.subr.bf16.mxu0 %v3001_v53 }
 0xb36   : > { %1938 = vmatpush1.bf16.msra.mxu0 %v2999_v54 }
 0xb37   : > { %1939 = vmatprep.subr.bf16.mxu0 %v3004_v60 }
 0xc00   : > { %v1720_v18 = vpop.f32.mrb[20].mxu0 }
 0xc01   : > { %v1726_v35 = vpack.c.bf16 %v1720_v18, %v1720_v18  ;;  %v2787_v36 = vpop.f32.mrb[21].mxu0  ;;  %v1846_v18 = vrot.slane %v1841_v17, %v3848_v44 }
 0xc02   : > { %v1723_v37 = vpop.f32.mrb[22].mxu0 }
 0xc03   : > { %v2788_v39 = vpop.f32.mrb[23].mxu0  ;;  %2794 = vmatmul.mubr.msk.bf16.vlgmr.msra.gmra.mrb[32].mxu1 %vm1116_vm3, %v1726_v35  ;;  %v1850_v35 = vrot.slane %v1841_v17, %v856_v46 }
 0xc04   : > { %2647 = vmatpush3.bf16.msra.mxu1 %v3018_v13  ;;  %v3040_v13 = vld [vmem:[#allocation16 + $0x38] sm:$0xff]  }
 0xc05   : > { %2648 = vmatprep.subr.bf16.mxu1 %v3019_v14 }
 0xc08   : > { %2649 = vmatpush3.bf16.msra.mxu1 %v3020_v15 }
 0xc09   : > { %2650 = vmatprep.subr.bf16.mxu1 %v3021_v25 }
 0xc0c   : > { %2651 = vmatpush3.bf16.msra.mxu1 %v3022_v28 }
 0xcd6   : > { %v1780_v40 = vpop.f32.mrb[32].mxu1 }
 0xcd7   : > { %v1786_v20 = vadd.f32 %v1780_v40, %v1618_v26  ;;  %v2795_v21 = vpop.f32.mrb[33].mxu1  ;;  %v3023_v26 = vld [vmem:[#allocation10 + $0x58] sm:$0xff]  }
 0xcd8   : > { %v1783_v0 = vpop.f32.mrb[34].mxu1  ;;  %2652 = vmatprep.subr.bf16.mxu1 %v3023_v26  ;;  %v2587_v26 = vld [vmem:[#allocation13] ss:$0 sm:$0xff] }
 0xcd9   : > { %v1794_v41 = vadd.f32 %v2551_v19, %v1786_v20  ;;  %v2796_v42 = vpop.f32.mrb[35].mxu1  ;;  %2653 = vmatpush3.bf16.msra.mxu1 %v3024_v27 }
 0xcda   : > { %2654 = vmatprep.subr.bf16.mxu1 %v3025_v29  ;;  %v2588_v29 = vld [vmem:[#allocation15] ss:$0 sm:$0xff] }
 0xcdb   : > { %v1795_v45 = vadd.f32 %v1794_v41, %v3837_v38  ;;  %v3002_v38 = vld [vmem:[#allocation9 + $0x30] ss:$8 sps:$4 sm:$0xff]  }
 0xcdc   : > { %1940 = vmatpush1.bf16.msra.mxu0 %v3002_v38 }
 0xcdd   : > { %1798 = vadd.xlane.f32.xlu1 %v1795_v45  ;;  %1941 = vmatprep.subr.bf16.mxu0 %v3007_v61 }
 0xcde   : > { %2655 = vmatpush3.bf16.msra.mxu1 %v3026_v30 }
 0xcdf   : > { %2656 = vmatprep.subr.bf16.mxu1 %v3027_v31 }
 0xce0   : > { %1942 = vmatpush1.bf16.msra.mxu0 %v3005_v62  ;;  %v2570_v62 = vld [vmem:[#allocation12] ss:$0 sm:$0xff] }
 0xce1   : > { %1943 = vmatprep.subr.bf16.mxu0 %v3010_v57 }
 0xce2   : > { %2657 = vmatpush3.bf16.msra.mxu1 %v3028_v32 }
 0xce3   : > { %2658 = vmatprep.subr.bf16.mxu1 %v3029_v33  ;;  %v2589_v33 = vld [vmem:[#allocation18] ss:$0 sm:$0xff] }
 0xce4   : > { %1944 = vmatpush1.bf16.msra.mxu0 %v3008_v63 }
 0xce5   : > { %1945 = vmatprep.subr.bf16.mxu0 %v3013_v22 }
 0xce6   : > { %2659 = vmatpush3.bf16.msra.mxu1 %v3030_v7 }
 0xce7   : > { %2660 = vmatprep.subr.bf16.mxu1 %v3031_v34 }
 0xce8   : > { %1946 = vmatpush1.bf16.msra.mxu0 %v3011_v23 }
 0xce9   : > { %1947 = vmatprep.subr.bf16.mxu0 %v3016_v24 }
 0xcea   : > { %2661 = vmatpush3.bf16.msra.mxu1 %v3032_v16 }
 0xcec   : > { %1948 = vmatpush1.bf16.msra.mxu0 %v3014_v2 }
 0xced   : > { %2797 = vmatprep.subr.bf16.mxu0 %v3423_v1 }
 0xd6a   : > { %v1799_v55 = vpop.xlane.xlu1 %1798 }
 0xd6b   : > { %v1801_v56 = vmul.f32 0.0078125, %v1799_v55 }
 0xd6d   : > { %v1802_v58 = vsub.f32 %v1795_v45, %v1801_v56 }
 0xd6f   : > { %v1803_v59 = vmul.f32 %v1802_v58, %v1802_v58 }
 0xd71   : > { %1804 = vadd.xlane.f32.xlu1 %v1803_v59 }
 0xdfe   : > { %v1805_v47 = vpop.xlane.xlu1 %1804 }
 0xdff   : > { %v1806_v48 = vmul.f32 0.0078125, %v1805_v47  ;;  %v3033_v47 = vld [vmem:[#allocation16] sm:$0xff]  }
 0xe01   : > { %v1807_v3 = vadd.f32 1e-12, %v1806_v48  ;;  %v3034_v48 = vld [vmem:[#allocation16 + $0x8] sm:$0xff]  }
 0xe03   : > { %3057 = vrsqrt.f32 %v1807_v3 }
 0xe0d   : > { %v3058_v4 = vpop.eup %3057 }
 0xe0e   : > { %v1809_v6 = vmul.f32 %v3058_v4, %v1802_v58 }
 0xe10   : > { %v1816_v9 = vmul.f32 %v2552_v5, %v1809_v6 }
 0xe12   : > { %v4015_v10 = vadd.f32 %v2553_v8, %v1816_v9  ;;  %v3035_v8 = vld [vmem:[#allocation16 + $0x10] sm:$0xff]   ;;  %v3036_v9 = vld [vmem:[#allocation16 + $0x18] sm:$0xff]  }
 0xe14   : > { %v1824_v11 = vpack.c.bf16 %v4015_v10, %v4015_v10 }
 0xe16   : > { %1966 = vmatmul.mubr.bf16.vlgmr.msra.gmra.mrb[24].mxu0 %v1824_v11  ;;  %v3038_v11 = vld [vmem:[#allocation16 + $0x28] sm:$0xff]  }
 0xe17   : > { %2813 = vmatprep.mubr.msk.bf16.mxu0 %vm3424_vm0, %v3423_v1  ;;  %2798 = vmatpush3.bf16.msra.mxu0 %v3033_v47 }
 0xe18   : > { %2799 = vmatprep.subr.bf16.mxu0 %v3423_v1 }
 0xe1b   : > { %2800 = vmatpush3.bf16.msra.mxu0 %v3034_v48 }
 0xe1c   : > { %2801 = vmatprep.subr.bf16.mxu0 %v3423_v1 }
 0xe1f   : > { %2802 = vmatpush3.bf16.msra.mxu0 %v3035_v8 }
 0xe20   : > { %2803 = vmatprep.subr.bf16.mxu0 %v3423_v1 }
 0xe23   : > { %2804 = vmatpush3.bf16.msra.mxu0 %v3036_v9 }
 0xe24   : > { %2805 = vmatprep.subr.bf16.mxu0 %v3423_v1 }
 0xee9   : > { %v1967_v36 = vpop.f32.mrb[24].mxu0 }
 0xeea   : > { %v1968_v37 = vadd.f32 %v1967_v36, %v1846_v18  ;;  %v1969_v39 = vpop.f32.mrb[25].mxu0 }
 0xeeb   : > { %v1970_v40 = vadd.f32 %v1969_v39, %v1850_v35  ;;  %v1971_v19 = vpop.f32.mrb[26].mxu0 }
 0xeec   : > { %v1974_v20 = vmul.f32 %v1968_v37, %v1968_v37  ;;  %v1972_v21 = vpop.f32.mrb[27].mxu0 }
 0xeed   : > { %v1975_v0 = vmul.f32 %v1970_v40, %v1970_v40 }
 0xeee   : > { %v1976_v41 = vmul.f32 %v1974_v20, %v1968_v37 }
 0xeef   : > { %v1977_v42 = vmul.f32 %v1975_v0, %v1970_v40 }
 0xef0   : > { %v1978_v45 = vmul.f32 0.044715, %v1976_v41 }
 0xef1   : > { %v1979_v49 = vmul.f32 0.044715, %v1977_v42 }
 0xef2   : > { %v1980_v50 = vadd.f32 %v1978_v45, %v1968_v37 }
 0xef3   : > { %v1981_v51 = vadd.f32 %v1979_v49, %v1970_v40 }
 0xef4   : > { %v1982_v52 = vmul.f32 0.7978846, %v1980_v50 }
 0xef5   : > { %v1983_v53 = vmul.f32 0.7978846, %v1981_v51 }
 0xef6   : > { %3059 = vtanh.f32 %v1982_v52 }
 0xef7   : > { %3061 = vtanh.f32 %v1983_v53 }
 0xf00   : > { %v3060_v43 = vpop.eup %3059 }
 0xf01   : > { %v3062_v44 = vpop.eup %3061  ;;  %v1986_v46 = vadd.f32 1.0, %v3060_v43 }
 0xf02   : > { %v1987_v54 = vadd.f32 1.0, %v3062_v44 }
 0xf03   : > { %v1988_v55 = vmul.f32 0.5, %v1986_v46 }
 0xf04   : > { %v1989_v56 = vmul.f32 0.5, %v1987_v54 }
 0xf05   : > { %v1990_v58 = vmul.f32 %v1988_v55, %v1968_v37 }
 0xf06   : > { %v1991_v59 = vmul.f32 %v1989_v56, %v1970_v40 }
 0xf07   : > { %v1992_v38 = vpack.c.bf16 %v1990_v58, %v1990_v58 }
 0xf08   : > { %v1993_v60 = vpack.c.bf16 %v1991_v59, %v1991_v59 }
 0xf0a   : > { %2161 = vmatprep.mubr.bf16.mxu1 %v1993_v60 }
 0xf0b   : > { %2162 = vmatmul.mubr.bf16.vlgmr.msra.gmra.mrb[36].mxu1 %v1992_v38 }
 0xfde   : > { %v2662_v61 = vpop.f32.mrb[36].mxu1 }
 0xfdf   : > { %v2663_v57 = vpop.f32.mrb[37].mxu1 }
 0xfe0   : > { %v2664_v63 = vadd.f32 %v2663_v57, %v2662_v61  ;;  %v2665_v22 = vpop.f32.mrb[38].mxu1 }
 0xfe1   : > { %v2666_v23 = vpop.f32.mrb[39].mxu1 }
 0xfe2   : > { %v2164_v24 = vadd.f32 %v2664_v63, %v2570_v62 }
 0xfe4   : > { %v2169_v2 = vadd.f32 %v2164_v24, %v4015_v10  ;;  %v3037_v10 = vld [vmem:[#allocation16 + $0x20] sm:$0xff]  }
 0xfe5   : > { %2806 = vmatpush3.bf16.msra.mxu0 %v3037_v10 }
 0xfe6   : > { %2172 = vadd.xlane.f32.xlu1 %v2169_v2  ;;  %2807 = vmatprep.subr.bf16.mxu0 %v3423_v1 }
 0xfe9   : > { %2808 = vmatpush3.bf16.msra.mxu0 %v3038_v11 }
 0xfea   : > { %2809 = vmatprep.subr.bf16.mxu0 %v3423_v1 }
 0xfed   : > { %2810 = vmatpush3.bf16.msra.mxu0 %v3039_v12 }
 0xfee   : > { %2811 = vmatprep.subr.bf16.mxu0 %v3423_v1 }
 0xff1   : > { %2812 = vmatpush3.bf16.msra.mxu0 %v3040_v13 }
0x1073   : > { %v2173_v3 = vpop.xlane.xlu1 %2172 }
0x1074   : > { %v2174_v4 = vmul.f32 0.0078125, %v2173_v3 }
0x1076   : > { %v2175_v5 = vsub.f32 %v2169_v2, %v2174_v4 }
0x1078   : > { %v2176_v6 = vmul.f32 %v2175_v5, %v2175_v5 }
0x107a   : > { %2177 = vadd.xlane.f32.xlu1 %v2176_v6 }
0x1107   : > { %v2178_v14 = vpop.xlane.xlu1 %2177 }
0x1108   : > { %v2179_v15 = vmul.f32 0.0078125, %v2178_v14 }
0x110a   : > { %v2180_v25 = vadd.f32 1e-12, %v2179_v15 }
0x110c   : > { %3063 = vrsqrt.f32 %v2180_v25 }
0x1116   : > { %v3064_v28 = vpop.eup %3063 }
0x1117   : > { %v2182_v27 = vmul.f32 %v3064_v28, %v2175_v5 }
0x1119   : > { %v2189_v30 = vmul.f32 %v2587_v26, %v2182_v27 }
0x111b   : > { %v2196_v31 = vadd.f32 %v2588_v29, %v2189_v30 }
0x111d   : > { %v2197_v32 = vpack.c.bf16 %v2196_v31, %v2196_v31 }
0x111f   : > { %2814 = vmatmul.mubr.bf16.vlgmr.msra.gmra.mrb[28].mxu0 %v2197_v32 }
0x11f2   : > { %v2303_v1 = vpop.f32.mrb[28].mxu0 }
0x11f3   : > { %v2304_v7 = vadd.f32 %v2589_v33, %v2303_v1  ;;  %v2815_v34 = vpop.f32.mrb[29].mxu0 }
0x11f4   : > { %v2306_v16 = vpop.f32.mrb[30].mxu0 }
0x11f5   : > { %2309 = vst [vmem:[%s718_s1] sm:$0xff] %v2304_v7  ;;  %v2816_v17 = vpop.f32.mrb[31].mxu0 }
0x11f6 PF: > { %s4103_s21 = sld [smem:[#allocation25_spill]] }
0x11fc   : > { %s34_s27 = sadd.s32 1, %s4103_s21  }
0x11fd   : > { %p31_p2 = scmp.ge.s32.totalorder %s34_s27, 4  }
0x11ff   :  { %33 = sbr.rel (!%p31_p2) target bundleno = 15 (0xf), region = 168 }
0x1206   :  { %2329 = vsyncpa [#allocation3], 1 }
0x1207   :  { %2331 = vsyncpa [#allocation3 + $0x1], 1 }
0x1208   :  { %2332 = vsyncpa [#allocation5], 1 }
0x1209   :  { %2333 = vsyncpa [#allocation8], 1 }
0x120a   :  { %2334 = vsyncpa [#allocation11], 1 }
0x120b   :  { %2335 = vsyncpa [#allocation14], 1 }
0x120c   :  { %2336 = vsyncpa [#allocation17], 1 }

</bundles_post_ra>
